<compile_context>
chip_gen: v7x
topology: tpu7x:2x2x1
jax: 0.10.0
libtpu: 0.0.40
codegen_flags: <defaults>
</compile_context>

<pallas_src>
from functools import partial

import jax
import jax.numpy as jnp
from jax import lax
from jax.experimental import pallas as pl
from jax.experimental.pallas import tpu as pltpu

N_Z = 64     # hyper embedding size (fixed in the torch module)
B_BLK = 16   # hyper block size     (fixed in the torch module)


# ----------------------------------------------------------------------------
# Hypernetwork kernel: one grid step per hyper block-row i (of B_BLK)
#   a[l, :]      = z[l, :] @ W1[i].T + B1[i]          (L, N_z)
#   K_out[i, l]  = a[l, :] @ W2.T    + B2             (L, B_BLK*k*k)
# ----------------------------------------------------------------------------
def _hyper_kernel(z_ref, w1t_ref, b1_ref, w2t_ref, b2_ref, k_ref):
    a = jnp.dot(z_ref[...], w1t_ref[0],
                preferred_element_type=jnp.float32) + b1_ref[0]          # (L, N_z)
    k_ref[0] = jnp.dot(a, w2t_ref[...],
                       preferred_element_type=jnp.float32) + b2_ref[...]  # (L, B*k*k)


def hyper_generate_K(z, W1, B1, W2, B2):
    """Returns K_out with K_out[i, l, m] == (torch) K[l, i, m]."""
    L = z.shape[0]
    Bb, Nz, _ = W1.shape
    M2 = W2.shape[0]                       # B_BLK * k * k
    z2 = z.reshape(L, Nz)                  # (L, 1, Nz, 1) -> (L, Nz)
    W1t = jnp.transpose(W1, (0, 2, 1))     # per-row W1[i].T
    B1r = B1.reshape(Bb, 1, Nz)
    W2t = W2.T                             # (Nz, M2)
    B2r = B2.reshape(1, M2)
    return pl.pallas_call(
        _hyper_kernel,
        out_shape=jax.ShapeDtypeStruct((Bb, L, M2), jnp.float32),
        grid=(Bb,),
        in_specs=[
            pl.BlockSpec((L, Nz), lambda i: (0, 0)),
            pl.BlockSpec((1, Nz, Nz), lambda i: (i, 0, 0)),
            pl.BlockSpec((1, 1, Nz), lambda i: (i, 0, 0)),
            pl.BlockSpec((Nz, M2), lambda i: (0, 0)),
            pl.BlockSpec((1, M2), lambda i: (0, 0)),
        ],
        out_specs=pl.BlockSpec((1, L, M2), lambda i: (i, 0, 0)),
        compiler_params=pltpu.CompilerParams(dimension_semantics=("parallel",)),
    )(z2, W1t, B1r, W2t, B2r)


# ----------------------------------------------------------------------------
# Conv2d kernel: im2col matmul per (batch, row-tile, Cout-tile) grid step.
# Halo rows come from a second BlockSpec on the same padded input (block t+1).
# ----------------------------------------------------------------------------
def _conv_im2col_kernel(xa_ref, xb_ref, w_ref, b_ref, o_ref, patch_ref, *,
                        ksize, stride, TH, Wout, Cin, halo, TC):
    xa = xa_ref[0]                                           # (TH*stride, Wp, Cin)
    if halo > 0:
        x_win = jnp.concatenate([xa, xb_ref[0, :halo]], axis=0)
    else:
        x_win = xa
    # im2col: pack the k*k shifted (TH, Wout, Cin) patches into the VMEM scratch.
    for kh in range(ksize):
        for kw in range(ksize):
            if stride == 1:
                sl = x_win[kh:kh + TH, kw:kw + Wout, :]
            else:
                sl = x_win[kh:kh + (TH - 1) * stride + 1:stride,
                           kw:kw + (Wout - 1) * stride + 1:stride, :]
            col = (kh * ksize + kw) * Cin
            patch_ref[:, col:col + Cin] = sl.reshape(TH * Wout, Cin)
    # One MXU matmul per tile: (TH*Wout, k*k*Cin) @ (k*k*Cin, TC) + bias.
    acc = jnp.dot(patch_ref[...], w_ref[...], preferred_element_type=jnp.float32)
    o_ref[0] = (acc + b_ref[...]).reshape(TH, Wout, TC)


def _pick_row_tile(Hout, Wout, ksize, stride):
    divs = [d for d in range(1, Hout + 1) if Hout % d == 0]
    ok = [d for d in divs if d * stride + stride >= ksize]   # halo fits in the next block
    if not ok:
        return Hout
    pref = [d for d in ok if d * Wout <= 128]                # ~one MXU M-tile of rows
    return max(pref) if pref else min(ok)


def conv2d_im2col(x_nchw, w_mat, bias_vec, *, ksize, stride):
    """x: (N, Cin, H, W) f32; w_mat: (k*k*Cin, Cout) im2col weights; bias: (Cout,)."""
    N, Cin, H, W = x_nchw.shape
    KKC, Cout = w_mat.shape
    assert KKC == ksize * ksize * Cin
    pad = ksize // 2
    Hout = (H + 2 * pad - ksize) // stride + 1
    Wout = (W + 2 * pad - ksize) // stride + 1
    Wp = W + 2 * pad

    TH = _pick_row_tile(Hout, Wout, ksize, stride)
    T = Hout // TH
    rows_blk = TH * stride
    halo = max(ksize - stride, 0)

    TC = 128                                   # lane-dense Cout tile
    Cout_p = ((Cout + TC - 1) // TC) * TC
    w_p = jnp.pad(w_mat, ((0, 0), (0, Cout_p - Cout)))
    b_p = jnp.pad(bias_vec, (0, Cout_p - Cout)).reshape(1, Cout_p)

    # NCHW -> NHWC and spatial zero-pad; the bottom is padded out to (T+1) row blocks so
    # the halo BlockSpec (block index t+1) always stays in bounds.
    x_nhwc = jnp.transpose(x_nchw, (0, 2, 3, 1))
    Hp_blk = (T + 1) * rows_blk
    pad_bottom = Hp_blk - H - pad
    assert pad_bottom >= pad, "row tile too small for this kernel size"
    x_pad = jnp.pad(x_nhwc, ((0, 0), (pad, pad_bottom), (pad, pad), (0, 0)))

    kernel = partial(_conv_im2col_kernel, ksize=ksize, stride=stride, TH=TH,
                     Wout=Wout, Cin=Cin, halo=halo, TC=TC)

    out_p = pl.pallas_call(
        kernel,
        out_shape=jax.ShapeDtypeStruct((N, Hout, Wout, Cout_p), jnp.float32),
        grid=(N, T, Cout_p // TC),
        in_specs=[
            pl.BlockSpec((1, rows_blk, Wp, Cin), lambda n, t, c: (n, t, 0, 0)),
            pl.BlockSpec((1, rows_blk, Wp, Cin), lambda n, t, c: (n, t + 1, 0, 0)),
            pl.BlockSpec((KKC, TC), lambda n, t, c: (0, c)),
            pl.BlockSpec((1, TC), lambda n, t, c: (0, c)),
        ],
        out_specs=pl.BlockSpec((1, TH, Wout, TC), lambda n, t, c: (n, t, 0, c)),
        scratch_shapes=[pltpu.VMEM((TH * Wout, KKC), jnp.float32)],
        compiler_params=pltpu.CompilerParams(
            dimension_semantics=("parallel", "parallel", "parallel"),
            vmem_limit_bytes=32 * 1024 * 1024,
        ),
    )(x_pad, x_pad, w_p, b_p)

    return jnp.transpose(out_p[..., :Cout], (0, 3, 1, 2))


# ----------------------------------------------------------------------------
# HyperConv forward
# ----------------------------------------------------------------------------
def hyper_conv_forward(x, params, *, kernel_size, stride=1):
    k = kernel_size
    in_channels = x.shape[1]
    out_channels = params["bias"].shape[0]

    K_out = hyper_generate_K(params["z"], params["W1"], params["B1"],
                             params["W2"], params["B2"])         # (B, L, B*k*k)
    K_t = jnp.transpose(K_out, (1, 0, 2))                        # == torch K, (L, B, B*k*k)

    # Exact replica of the torch reshape/permute chain -> OIHW (tiny tensor).
    weight = (K_t.reshape(out_channels // B_BLK, in_channels, B_BLK * k * k)
                 .transpose(1, 0, 2)
                 .reshape(in_channels, out_channels, k, k)
                 .transpose(1, 0, 2, 3))
    # Emit the layout the conv kernel consumes: im2col (k*k*Cin, Cout), row=(kh,kw,ci).
    w_mat = weight.transpose(2, 3, 1, 0).reshape(k * k * in_channels, out_channels)

    return conv2d_im2col(x, w_mat, params["bias"], ksize=k, stride=stride)


def init_params(key, in_channels, out_channels, kernel_size):
    assert (in_channels * out_channels) % (B_BLK * B_BLK) == 0
    assert out_channels % B_BLK == 0
    L = in_channels * out_channels // (B_BLK * B_BLK)
    k1, k2, k3, k4, k5 = jax.random.split(key, 5)
    fm = lambda a: jnp.fmod(a, 2.0)
    return {
        "z":  fm(jax.random.normal(k1, (L, 1, N_Z, 1), jnp.float32)),
        "W1": fm(jax.random.normal(k2, (B_BLK, N_Z, N_Z), jnp.float32)),
        "B1": fm(jax.random.normal(k3, (B_BLK, N_Z), jnp.float32)),
        "W2": fm(jax.random.normal(k4, (B_BLK * kernel_size ** 2, N_Z), jnp.float32)),
        "B2": fm(jax.random.normal(k5, (B_BLK * kernel_size ** 2,), jnp.float32)),
        "bias": jnp.zeros((out_channels,), jnp.float32),  # module: bias=True -> zeros
    }


# ----------------------------------------------------------------------------
# Pure-JAX reference (verbatim translation of the torch forward)
# ----------------------------------------------------------------------------
def hyper_conv_reference(x, params, *, kernel_size, stride=1):
    k = kernel_size
    in_channels = x.shape[1]
    out_channels = params["bias"].shape[0]
    W1, B1, W2, B2, z = (params["W1"], params["B1"], params["W2"],
                         params["B2"], params["z"])
    a = jnp.matmul(W1, z, precision=lax.Precision.HIGHEST) + B1[..., None]
    K = jnp.matmul(W2, a, precision=lax.Precision.HIGHEST)[..., 0] + B2
    weight = (K.reshape(out_channels // B_BLK, in_channels, -1)
                .transpose(1, 0, 2)
                .reshape(in_channels, out_channels, k, k)
                .transpose(1, 0, 2, 3))
    pad = k // 2
    out = lax.conv_general_dilated(
        x, weight, (stride, stride), [(pad, pad), (pad, pad)],
        dimension_numbers=("NCHW", "OIHW", "NCHW"),
        precision=lax.Precision.HIGHEST)
    return out + params["bias"][None, :, None, None]


if __name__ == "__main__":
    in_channels, out_channels, kernel_size, stride = 16, 16, 3, 1
    batch, H, W = 2, 16, 16

    key = jax.random.PRNGKey(0)
    kx, kp = jax.random.split(key)
    params = init_params(kp, in_channels, out_channels, kernel_size)
    x = jax.random.normal(kx, (batch, in_channels, H, W), jnp.float32)

    fwd = jax.jit(partial(hyper_conv_forward, kernel_size=kernel_size, stride=stride))
    out = jax.block_until_ready(fwd(x, params))

    ref = hyper_conv_reference(x, params, kernel_size=kernel_size, stride=stride)
    assert out.shape == ref.shape == (batch, out_channels, H, W), (out.shape, ref.shape)
    max_abs = float(jnp.max(jnp.abs(out - ref)))
    assert jnp.allclose(out, ref, rtol=2e-3, atol=2e-2), max_abs
    print("KERNEL_OK")
</pallas_src>

<mosaic_0001>
module attributes {stable_mosaic.version = 11 : i64} {
  func.func @_hyper_kernel(%arg0: i32, %arg1: memref<1x64xf32, #tpu.memory_space<vmem>>, %arg2: memref<1x64x64xf32, #tpu.memory_space<vmem>>, %arg3: memref<1x1x64xf32, #tpu.memory_space<vmem>>, %arg4: memref<64x144xf32, #tpu.memory_space<vmem>>, %arg5: memref<1x144xf32, #tpu.memory_space<vmem>>, %arg6: memref<1x1x144xf32, #tpu.memory_space<vmem>>) attributes {dimension_semantics = [#tpu.dimension_semantics<parallel>], iteration_bounds = array<i64: 16>, scalar_prefetch = 0 : i64, scratch_operands = 0 : i64, tpu.core_type = #tpu.core_type<tc>, window_params = [{pipeline_mode = #tpu.pipeline_mode<synchronous>, transform_indices = @transform_0, window_bounds = array<i64: 1, 64>}, {transform_indices = @transform_1, window_bounds = array<i64: 1, 64, 64>}, {transform_indices = @transform_2, window_bounds = array<i64: 1, 1, 64>}, {pipeline_mode = #tpu.pipeline_mode<synchronous>, transform_indices = @transform_3, window_bounds = array<i64: 64, 144>}, {pipeline_mode = #tpu.pipeline_mode<synchronous>, transform_indices = @transform_4, window_bounds = array<i64: 1, 144>}, {transform_indices = @transform_5, window_bounds = array<i64: 1, 1, 144>}]} {
    %c0 = arith.constant 0 : index
    %c0_0 = arith.constant 0 : index
    %0 = vector.load %arg1[%c0, %c0_0] : memref<1x64xf32, #tpu.memory_space<vmem>>, vector<1x64xf32>
    %c0_1 = arith.constant 0 : index
    %c0_2 = arith.constant 0 : index
    %c0_3 = arith.constant 0 : index
    %1 = vector.load %arg2[%c0_1, %c0_2, %c0_3] : memref<1x64x64xf32, #tpu.memory_space<vmem>>, vector<1x64x64xf32>
    %2 = vector.shape_cast %1 : vector<1x64x64xf32> to vector<64x64xf32>
    %cst = arith.constant dense<0.000000e+00> : vector<1x64xf32>
    %3 = tpu.matmul %0, %2, %cst {dimension_numbers = #tpu.dot_dimension_numbers<[1], [0], [0], [1], [0, 0, 1, 1], [], []>} : vector<1x64xf32>, vector<64x64xf32>, vector<1x64xf32> -> vector<1x64xf32>
    %c0_4 = arith.constant 0 : index
    %c0_5 = arith.constant 0 : index
    %c0_6 = arith.constant 0 : index
    %4 = vector.load %arg3[%c0_4, %c0_5, %c0_6] : memref<1x1x64xf32, #tpu.memory_space<vmem>>, vector<1x1x64xf32>
    %5 = vector.shape_cast %4 : vector<1x1x64xf32> to vector<1x64xf32>
    %6 = arith.addf %3, %5 : vector<1x64xf32>
    %c0_7 = arith.constant 0 : index
    %c0_8 = arith.constant 0 : index
    %7 = vector.load %arg4[%c0_7, %c0_8] : memref<64x144xf32, #tpu.memory_space<vmem>>, vector<64x144xf32>
    %cst_9 = arith.constant dense<0.000000e+00> : vector<1x144xf32>
    %8 = tpu.matmul %6, %7, %cst_9 {dimension_numbers = #tpu.dot_dimension_numbers<[1], [0], [0], [1], [0, 0, 1, 1], [], []>} : vector<1x64xf32>, vector<64x144xf32>, vector<1x144xf32> -> vector<1x144xf32>
    %c0_10 = arith.constant 0 : index
    %c0_11 = arith.constant 0 : index
    %9 = vector.load %arg5[%c0_10, %c0_11] : memref<1x144xf32, #tpu.memory_space<vmem>>, vector<1x144xf32>
    %10 = arith.addf %8, %9 : vector<1x144xf32>
    %c0_12 = arith.constant 0 : index
    %c0_13 = arith.constant 0 : index
    %c0_14 = arith.constant 0 : index
    %11 = vector.load %arg6[%c0_12, %c0_13, %c0_14] : memref<1x1x144xf32, #tpu.memory_space<vmem>>, vector<1x1x144xf32>
    %12 = vector.shape_cast %11 : vector<1x1x144xf32> to vector<1x144xf32>
    %13 = vector.shape_cast %10 : vector<1x144xf32> to vector<1x1x144xf32>
    tpu.vector_store %arg6[%c0_12, %c0_13, %c0_14], %13 {strides = array<i32>} : memref<1x1x144xf32, #tpu.memory_space<vmem>>, vector<1x1x144xf32>,
    return
  }
  func.func @transform_0(%arg0: i32) -> (i32, i32) {
    %c0_i32 = arith.constant 0 : i32
    %c0_i32_0 = arith.constant 0 : i32
    %c0_i32_1 = arith.constant 0 : i32
    return %c0_i32, %c0_i32_0 : i32, i32
  }
  func.func @transform_1(%arg0: i32) -> (i32, i32, i32) {
    %c0_i32 = arith.constant 0 : i32
    %c0_i32_0 = arith.constant 0 : i32
    %c0_i32_1 = arith.constant 0 : i32
    return %arg0, %c0_i32, %c0_i32_0 : i32, i32, i32
  }
  func.func @transform_2(%arg0: i32) -> (i32, i32, i32) {
    %c0_i32 = arith.constant 0 : i32
    %c0_i32_0 = arith.constant 0 : i32
    %c0_i32_1 = arith.constant 0 : i32
    return %arg0, %c0_i32, %c0_i32_0 : i32, i32, i32
  }
  func.func @transform_3(%arg0: i32) -> (i32, i32) {
    %c0_i32 = arith.constant 0 : i32
    %c0_i32_0 = arith.constant 0 : i32
    %c0_i32_1 = arith.constant 0 : i32
    return %c0_i32, %c0_i32_0 : i32, i32
  }
  func.func @transform_4(%arg0: i32) -> (i32, i32) {
    %c0_i32 = arith.constant 0 : i32
    %c0_i32_0 = arith.constant 0 : i32
    %c0_i32_1 = arith.constant 0 : i32
    return %c0_i32, %c0_i32_0 : i32, i32
  }
  func.func @transform_5(%arg0: i32) -> (i32, i32, i32) {
    %c0_i32 = arith.constant 0 : i32
    %c0_i32_0 = arith.constant 0 : i32
    %c0_i32_1 = arith.constant 0 : i32
    return %arg0, %c0_i32, %c0_i32_0 : i32, i32, i32
  }
}

module attributes {stable_mosaic.version = 11 : i64} {
  func.func @_conv_im2col_kernel(%arg0: i32, %arg1: i32, %arg2: i32, %arg3: memref<1x8x18x16xf32, #tpu.memory_space<vmem>>, %arg4: memref<1x8x18x16xf32, #tpu.memory_space<vmem>>, %arg5: memref<144x128xf32, #tpu.memory_space<vmem>>, %arg6: memref<1x128xf32, #tpu.memory_space<vmem>>, %arg7: memref<1x8x16x128xf32, #tpu.memory_space<vmem>>, %arg8: memref<128x144xf32, #tpu.memory_space<vmem>>) attributes {dimension_semantics = [#tpu.dimension_semantics<parallel>, #tpu.dimension_semantics<parallel>, #tpu.dimension_semantics<parallel>], iteration_bounds = array<i64: 2, 2, 1>, scalar_prefetch = 0 : i64, scratch_operands = 1 : i64, tpu.core_type = #tpu.core_type<tc>, window_params = [{transform_indices = @transform_0, window_bounds = array<i64: 1, 8, 18, 16>}, {transform_indices = @transform_1, window_bounds = array<i64: 1, 8, 18, 16>}, {transform_indices = @transform_2, window_bounds = array<i64: 144, 128>}, {transform_indices = @transform_3, window_bounds = array<i64: 1, 128>}, {transform_indices = @transform_4, window_bounds = array<i64: 1, 8, 16, 128>}]} {
    %c0 = arith.constant 0 : index
    %c0_0 = arith.constant 0 : index
    %c0_1 = arith.constant 0 : index
    %c0_2 = arith.constant 0 : index
    %0 = vector.load %arg3[%c0, %c0_0, %c0_1, %c0_2] : memref<1x8x18x16xf32, #tpu.memory_space<vmem>>, vector<1x8x18x16xf32>
    %1 = vector.shape_cast %0 : vector<1x8x18x16xf32> to vector<8x18x16xf32>
    %c0_3 = arith.constant 0 : index
    %c0_4 = arith.constant 0 : index
    %c0_5 = arith.constant 0 : index
    %c0_6 = arith.constant 0 : index
    %2 = vector.load %arg4[%c0_3, %c0_4, %c0_5, %c0_6] : memref<1x8x18x16xf32, #tpu.memory_space<vmem>>, vector<1x2x18x16xf32>
    %3 = vector.shape_cast %2 : vector<1x2x18x16xf32> to vector<2x18x16xf32>
    %4 = tpu.concatenate %1, %3 in 0 : vector<8x18x16xf32>, vector<2x18x16xf32> -> vector<10x18x16xf32>
    %5 = vector.extract_strided_slice %4 {offsets = [0, 0, 0], sizes = [8, 16, 16], strides = [1, 1, 1]} : vector<10x18x16xf32> to vector<8x16x16xf32>
    %6 = vector.shape_cast %5 : vector<8x16x16xf32> to vector<128x16xf32>
    %c0_7 = arith.constant 0 : index
    %c0_8 = arith.constant 0 : index
    %7 = vector.load %arg8[%c0_7, %c0_8] : memref<128x144xf32, #tpu.memory_space<vmem>>, vector<128x16xf32>
    tpu.vector_store %arg8[%c0_7, %c0_8], %6 {strides = array<i32>} : memref<128x144xf32, #tpu.memory_space<vmem>>, vector<128x16xf32>,
    %8 = vector.extract_strided_slice %4 {offsets = [0, 1, 0], sizes = [8, 16, 16], strides = [1, 1, 1]} : vector<10x18x16xf32> to vector<8x16x16xf32>
    %9 = vector.shape_cast %8 : vector<8x16x16xf32> to vector<128x16xf32>
    %c0_9 = arith.constant 0 : index
    %c16 = arith.constant 16 : index
    %10 = vector.load %arg8[%c0_9, %c16] : memref<128x144xf32, #tpu.memory_space<vmem>>, vector<128x16xf32>
    tpu.vector_store %arg8[%c0_9, %c16], %9 {strides = array<i32>} : memref<128x144xf32, #tpu.memory_space<vmem>>, vector<128x16xf32>,
    %11 = vector.extract_strided_slice %4 {offsets = [0, 2, 0], sizes = [8, 16, 16], strides = [1, 1, 1]} : vector<10x18x16xf32> to vector<8x16x16xf32>
    %12 = vector.shape_cast %11 : vector<8x16x16xf32> to vector<128x16xf32>
    %c0_10 = arith.constant 0 : index
    %c32 = arith.constant 32 : index
    %13 = vector.load %arg8[%c0_10, %c32] : memref<128x144xf32, #tpu.memory_space<vmem>>, vector<128x16xf32>
    tpu.vector_store %arg8[%c0_10, %c32], %12 {strides = array<i32>} : memref<128x144xf32, #tpu.memory_space<vmem>>, vector<128x16xf32>,
    %14 = vector.extract_strided_slice %4 {offsets = [1, 0, 0], sizes = [8, 16, 16], strides = [1, 1, 1]} : vector<10x18x16xf32> to vector<8x16x16xf32>
    %15 = vector.shape_cast %14 : vector<8x16x16xf32> to vector<128x16xf32>
    %c0_11 = arith.constant 0 : index
    %c48 = arith.constant 48 : index
    %16 = vector.load %arg8[%c0_11, %c48] : memref<128x144xf32, #tpu.memory_space<vmem>>, vector<128x16xf32>
    tpu.vector_store %arg8[%c0_11, %c48], %15 {strides = array<i32>} : memref<128x144xf32, #tpu.memory_space<vmem>>, vector<128x16xf32>,
    %17 = vector.extract_strided_slice %4 {offsets = [1, 1, 0], sizes = [8, 16, 16], strides = [1, 1, 1]} : vector<10x18x16xf32> to vector<8x16x16xf32>
    %18 = vector.shape_cast %17 : vector<8x16x16xf32> to vector<128x16xf32>
    %c0_12 = arith.constant 0 : index
    %c64 = arith.constant 64 : index
    %19 = vector.load %arg8[%c0_12, %c64] : memref<128x144xf32, #tpu.memory_space<vmem>>, vector<128x16xf32>
    tpu.vector_store %arg8[%c0_12, %c64], %18 {strides = array<i32>} : memref<128x144xf32, #tpu.memory_space<vmem>>, vector<128x16xf32>,
    %20 = vector.extract_strided_slice %4 {offsets = [1, 2, 0], sizes = [8, 16, 16], strides = [1, 1, 1]} : vector<10x18x16xf32> to vector<8x16x16xf32>
    %21 = vector.shape_cast %20 : vector<8x16x16xf32> to vector<128x16xf32>
    %c0_13 = arith.constant 0 : index
    %c80 = arith.constant 80 : index
    %22 = vector.load %arg8[%c0_13, %c80] : memref<128x144xf32, #tpu.memory_space<vmem>>, vector<128x16xf32>
    tpu.vector_store %arg8[%c0_13, %c80], %21 {strides = array<i32>} : memref<128x144xf32, #tpu.memory_space<vmem>>, vector<128x16xf32>,
    %23 = vector.extract_strided_slice %4 {offsets = [2, 0, 0], sizes = [8, 16, 16], strides = [1, 1, 1]} : vector<10x18x16xf32> to vector<8x16x16xf32>
    %24 = vector.shape_cast %23 : vector<8x16x16xf32> to vector<128x16xf32>
    %c0_14 = arith.constant 0 : index
    %c96 = arith.constant 96 : index
    %25 = vector.load %arg8[%c0_14, %c96] : memref<128x144xf32, #tpu.memory_space<vmem>>, vector<128x16xf32>
    tpu.vector_store %arg8[%c0_14, %c96], %24 {strides = array<i32>} : memref<128x144xf32, #tpu.memory_space<vmem>>, vector<128x16xf32>,
    %26 = vector.extract_strided_slice %4 {offsets = [2, 1, 0], sizes = [8, 16, 16], strides = [1, 1, 1]} : vector<10x18x16xf32> to vector<8x16x16xf32>
    %27 = vector.shape_cast %26 : vector<8x16x16xf32> to vector<128x16xf32>
    %c0_15 = arith.constant 0 : index
    %c112 = arith.constant 112 : index
    %28 = vector.load %arg8[%c0_15, %c112] : memref<128x144xf32, #tpu.memory_space<vmem>>, vector<128x16xf32>
    tpu.vector_store %arg8[%c0_15, %c112], %27 {strides = array<i32>} : memref<128x144xf32, #tpu.memory_space<vmem>>, vector<128x16xf32>,
    %29 = vector.extract_strided_slice %4 {offsets = [2, 2, 0], sizes = [8, 16, 16], strides = [1, 1, 1]} : vector<10x18x16xf32> to vector<8x16x16xf32>
    %30 = vector.shape_cast %29 : vector<8x16x16xf32> to vector<128x16xf32>
    %c0_16 = arith.constant 0 : index
    %c128 = arith.constant 128 : index
    %31 = vector.load %arg8[%c0_16, %c128] : memref<128x144xf32, #tpu.memory_space<vmem>>, vector<128x16xf32>
    tpu.vector_store %arg8[%c0_16, %c128], %30 {strides = array<i32>} : memref<128x144xf32, #tpu.memory_space<vmem>>, vector<128x16xf32>,
    %c0_17 = arith.constant 0 : index
    %c0_18 = arith.constant 0 : index
    %32 = vector.load %arg8[%c0_17, %c0_18] : memref<128x144xf32, #tpu.memory_space<vmem>>, vector<128x144xf32>
    %c0_19 = arith.constant 0 : index
    %c0_20 = arith.constant 0 : index
    %33 = vector.load %arg5[%c0_19, %c0_20] : memref<144x128xf32, #tpu.memory_space<vmem>>, vector<144x128xf32>
    %cst = arith.constant dense<0.000000e+00> : vector<128x128xf32>
    %34 = tpu.matmul %32, %33, %cst {dimension_numbers = #tpu.dot_dimension_numbers<[1], [0], [0], [1], [0, 0, 1, 1], [], []>} : vector<128x144xf32>, vector<144x128xf32>, vector<128x128xf32> -> vector<128x128xf32>
    %c0_21 = arith.constant 0 : index
    %c0_22 = arith.constant 0 : index
    %35 = vector.load %arg6[%c0_21, %c0_22] : memref<1x128xf32, #tpu.memory_space<vmem>>, vector<1x128xf32>
    %36 = vector.broadcast %35 : vector<1x128xf32> to vector<128x128xf32>
    %37 = arith.addf %34, %36 : vector<128x128xf32>
    %38 = vector.shape_cast %37 : vector<128x128xf32> to vector<8x16x128xf32>
    %c0_23 = arith.constant 0 : index
    %c0_24 = arith.constant 0 : index
    %c0_25 = arith.constant 0 : index
    %c0_26 = arith.constant 0 : index
    %39 = vector.load %arg7[%c0_23, %c0_24, %c0_25, %c0_26] : memref<1x8x16x128xf32, #tpu.memory_space<vmem>>, vector<1x8x16x128xf32>
    %40 = vector.shape_cast %39 : vector<1x8x16x128xf32> to vector<8x16x128xf32>
    %41 = vector.shape_cast %38 : vector<8x16x128xf32> to vector<1x8x16x128xf32>
    tpu.vector_store %arg7[%c0_23, %c0_24, %c0_25, %c0_26], %41 {strides = array<i32>} : memref<1x8x16x128xf32, #tpu.memory_space<vmem>>, vector<1x8x16x128xf32>,
    return
  }
  func.func @transform_0(%arg0: i32, %arg1: i32, %arg2: i32) -> (i32, i32, i32, i32) {
    %c0_i32 = arith.constant 0 : i32
    %c0_i32_0 = arith.constant 0 : i32
    %c0_i32_1 = arith.constant 0 : i32
    return %arg0, %arg1, %c0_i32, %c0_i32_0 : i32, i32, i32, i32
  }
  func.func @transform_1(%arg0: i32, %arg1: i32, %arg2: i32) -> (i32, i32, i32, i32) {
    %c1_i32 = arith.constant 1 : i32
    %0 = arith.addi %arg1, %c1_i32 : i32
    %c0_i32 = arith.constant 0 : i32
    %c0_i32_0 = arith.constant 0 : i32
    %c0_i32_1 = arith.constant 0 : i32
    return %arg0, %0, %c0_i32, %c0_i32_0 : i32, i32, i32, i32
  }
  func.func @transform_2(%arg0: i32, %arg1: i32, %arg2: i32) -> (i32, i32) {
    %c0_i32 = arith.constant 0 : i32
    %c0_i32_0 = arith.constant 0 : i32
    return %c0_i32, %arg2 : i32, i32
  }
  func.func @transform_3(%arg0: i32, %arg1: i32, %arg2: i32) -> (i32, i32) {
    %c0_i32 = arith.constant 0 : i32
    %c0_i32_0 = arith.constant 0 : i32
    return %c0_i32, %arg2 : i32, i32
  }
  func.func @transform_4(%arg0: i32, %arg1: i32, %arg2: i32) -> (i32, i32, i32, i32) {
    %c0_i32 = arith.constant 0 : i32
    %c0_i32_0 = arith.constant 0 : i32
    return %arg0, %arg1, %c0_i32, %arg2 : i32, i32, i32, i32
  }
}

</mosaic_0001>

<bundles_post_ra>
// kernel: hyper_conv_forward.2
= control target key start
LH: loop header
LB: loop body
LE: loop exit
PB: predicated region body
PF: predicated region fallthrough
CT: control target
= control target key end

     0   :  { %s631_s18 = smov 0   ;;  %s710_s0 = inlined_call_operand.vmem [shape: f32[1,64], index: 0, kind: input, shape index: {}]   ;;  %s711_s1 = inlined_call_operand.vmem [shape: f32[16,64,64], index: 1, kind: input, shape index: {}]   ;;  %s712_s2 = inlined_call_operand.vmem [shape: f32[16,1,64], index: 2, kind: input, shape index: {}]   ;;  %s713_s3 = inlined_call_operand.vmem [shape: f32[64,144], index: 3, kind: input, shape index: {}]   ;;  %s714_s4 = inlined_call_operand.vmem [shape: f32[1,144], index: 4, kind: input, shape index: {}]   ;;  %s715_s5 = inlined_call_operand.vmem [shape: f32[16,1,144], index: 5, kind: output, shape index: {}]  }
   0x1 LB: > { %s508_s19 = sadd.s32 4294967295, %s595_s18   ;;  %p512_p0 = scmp.ge.s32.totalorder %s595_s18, 1  ;;  %s595_s18 = sphi %s631_s18, %s15_s18  }
   0x2   : > { %p195_p1 = scmp.lt.s32.totalorder %s595_s18, 17 }
   0x4   : > { %p196_p2 = pnand %p512_p0, %p195_p1 }
   0x5   : > { %p225_p3 = scmp.lt.s32.totalorder (!%p196_p2), %s508_s19, 15  ;;  %v597_v0 = vmov (!%p196_p2), 0.0|0.0   ;;  %vm598_vm0 = vmmov (!%p196_p2), 0   ;;  %v599_v1 = vmov (!%p196_p2), 0.0   ;;  %v322_v2 = vld [vmem:[%s713_s3 + $0x8] sm:$0xff] (!%p196_p2)  ;;  %v324_v3 = vld [vmem:[%s713_s3 + $0x18] sm:$0xff] (!%p196_p2)  ;;  %v339_v43 = vlaneseq (!%p196_p2) }
   0x6   : > { %199 = sbr.rel (%p196_p2) target bundleno = 470 (0x1d6), region = 40  ;;  %549 = vmatprep.subr.bf16.mxu0 (!%p196_p2), %v597_v0  ;;  %546 = vmatprep.mubr.msk.f32.mxu0 (!%p196_p2), %vm598_vm0, %v599_v1  ;;  %v321_v4 = vld [vmem:[%s713_s3] sm:$0xff] (!%p196_p2)  ;;  %v561_v5 = vpack.c.bf16 (!%p196_p2), %v324_v3, %v322_v2  ;;  %v323_v6 = vld [vmem:[%s713_s3 + $0x10] sm:$0xff] (!%p196_p2)  ;;  %v326_v7 = vld [vmem:[%s713_s3 + $0x28] sm:$0xff] (!%p196_p2)  ;;  %vm247_vm1 = vcmask (!%p196_p2), 523264  }
   0x7   : > { %v328_v8 = vld [vmem:[%s713_s3 + $0x38] sm:$0xff] (!%p196_p2)  ;;  %416 = vmatprep.mubr.f32.mxu1 (!%p196_p2), %v599_v1  ;;  %v563_v9 = vpack.c.bf16 (!%p196_p2), %v323_v6, %v321_v4  ;;  %v325_v11 = vld [vmem:[%s713_s3 + $0x20] sm:$0xff] (!%p196_p2)  ;;  %v327_v12 = vld [vmem:[%s713_s3 + $0x30] sm:$0xff] (!%p196_p2)  ;;  %v340_v44 = vshrl.u32 (!%p196_p2), %v339_v43, 7  ;;  %v600_v48 = vmov (!%p196_p2), 1966171168  }
   0x8   : > { %v565_v10 = vpack.c.bf16 (!%p196_p2), %v328_v8, %v326_v7  ;;  %v330_v13 = vld [vmem:[%s713_s3 + $0x48] sm:$0xff] (!%p196_p2)  ;;  %562 = vmatprep.subr.bf16.mxu1 (!%p196_p2), %v561_v5  ;;  %v332_v14 = vld [vmem:[%s713_s3 + $0x58] sm:$0xff] (!%p196_p2)  ;;  %v567_v15 = vpack.c.bf16 (!%p196_p2), %v327_v12, %v325_v11  ;;  %v329_v16 = vld [vmem:[%s713_s3 + $0x40] sm:$0xff] (!%p196_p2)  ;;  %v427_v49 = vunpack.c.l.s4 (!%p196_p2), %v600_v48  ;;  %vm443_vm2 = vcmp.lt.s32.totalorder (!%p196_p2), %v339_v43, 144 }
   0x9   : > { %564 = vmatpush1.bf16.msra.mxu1 (!%p196_p2), %v563_v9  ;;  %v331_v17 = vld [vmem:[%s713_s3 + $0x50] sm:$0xff] (!%p196_p2)  ;;  %v569_v21 = vpack.c.bf16 (!%p196_p2), %v332_v14, %v330_v13  ;;  %v334_v24 = vld [vmem:[%s713_s3 + $0x68] sm:$0xff] (!%p196_p2)  ;;  %v336_v25 = vld [vmem:[%s713_s3 + $0x78] sm:$0xff] (!%p196_p2)  ;;  %v341_v45 = vsub.s32 (!%p196_p2), 0, %v340_v44  ;;  %v345_v47 = vsub.s32 (!%p196_p2), 1, %v340_v44 }
   0xa   : > { %566 = vmatprep.subr.bf16.mxu1 (!%p196_p2), %v565_v10  ;;  %v571_v27 = vpack.c.bf16 (!%p196_p2), %v331_v17, %v329_v16  ;;  %v573_v30 = vpack.c.bf16 (!%p196_p2), %v336_v25, %v334_v24  ;;  %v237_v35 = vld [vmem:[%s710_s0] sm:$0x1] (!%p196_p2)  ;;  %v335_v37 = vld [vmem:[%s713_s3 + $0x70] sm:$0xff] (!%p196_p2)  ;;  %v428_v52 = vunpack.c.0.s8 (!%p196_p2), %v427_v49 }
   0xb   : > { %v333_v36 = vld [vmem:[%s713_s3 + $0x60] sm:$0xff] (!%p196_p2) }
   0xc   : > { %v575_v38 = vpack.c.bf16 (!%p196_p2), %v335_v37, %v333_v36  ;;  %v337_v46 = vld [vmem:[%s714_s4] sm:$0x3] (!%p196_p2)  ;;  %v431_v57 = vsub.s32 (!%p196_p2), %v428_v52, %v340_v44 }
   0xd   : > { %s717_s19 = smov (!%p225_p3, %s508_s19), 15  ;;  %568 = vmatpush1.bf16.msra.mxu1 %v567_v15  ;;  %v342_v50 = vrot.slane %v337_v46, %v341_v45  ;;  %v346_v51 = vrot.slane %v337_v46, %v345_v47 }
   0xe   : > { %s520_s13 = sshll.u32 %s717_s19, 6  ;;  %570 = vmatprep.subr.bf16.mxu1 %v569_v21  ;;  %s232_s12 = scalar_lea.vmem %s712_s2, %s717_s19 }
   0xf   : > { %s229_s20 = scalar_lea.vmem %s711_s1, %s520_s13  ;;  %v246_v39 = vld [vmem:[%s232_s12] sm:$0x1]  ;;  %s515_s15 = sshll.u32 %s717_s19, 1 }
  0x10   : > { %v238_v18 = vld [vmem:[%s229_s20] sm:$0xff]  ;;  %v239_v19 = vld [vmem:[%s229_s20 + $0x8] sm:$0xff]  ;;  %v240_v20 = vld [vmem:[%s229_s20 + $0x10] sm:$0xff] }
  0x11   : > { %v550_v22 = vpack.c.bf16 %v239_v19, %v238_v18  ;;  %v241_v23 = vld [vmem:[%s229_s20 + $0x18] sm:$0xff]  ;;  %v242_v28 = vld [vmem:[%s229_s20 + $0x20] sm:$0xff]  ;;  %v243_v29 = vld [vmem:[%s229_s20 + $0x28] sm:$0xff]  ;;  %572 = vmatpush1.bf16.msra.mxu1 %v571_v27 }
  0x12   : > { %v553_v26 = vpack.c.bf16 %v241_v23, %v240_v20  ;;  %v556_v31 = vpack.c.bf16 %v243_v29, %v242_v28  ;;  %v244_v32 = vld [vmem:[%s229_s20 + $0x30] sm:$0xff]  ;;  %v245_v33 = vld [vmem:[%s229_s20 + $0x38] sm:$0xff]  ;;  %574 = vmatprep.subr.bf16.mxu1 %v573_v30  ;;  %s236_s20 = scalar_lea.vmem %s715_s5, %s515_s15 }
  0x13   : > { %551 = vmatpush3.bf16.msra.mxu0 %v550_v22  ;;  %v559_v34 = vpack.c.bf16 %v245_v33, %v244_v32 }
  0x14   : > { %552 = vmatprep.subr.bf16.mxu0 %v597_v0 }
  0x15   : > { %576 = vmatpush1.bf16.msra.mxu1 %v575_v38 }
  0x17   : > { %554 = vmatpush3.bf16.msra.mxu0 %v553_v26 }
  0x18   : > { %555 = vmatprep.subr.bf16.mxu0 %v597_v0 }
  0x1b   : > { %557 = vmatpush3.bf16.msra.mxu0 %v556_v31 }
  0x1c   : > { %558 = vmatprep.subr.bf16.mxu0 %v597_v0 }
  0x1f   : > { %560 = vmatpush3.bf16.msra.mxu0 %v559_v34 }
  0x22   : > { %547 = vmatmul.mubr.msk.f32.vlgmr.msra.gmra.mrb[0].mxu0 %vm247_vm1, %v237_v35 }
  0xf5   : > { %v317_v40 = vpop.f32.mrb[0].mxu0 }
  0xf6   : > { %v318_v41 = vadd.f32 %v317_v40, %v246_v39  ;;  %v548_v42 = vpop.f32.mrb[1].mxu0 }
  0xf8   : > { %517 = vmatmul.mubr.msk.f32.vlgmr.msra.gmra.mrb[0].mxu1 %vm247_vm1, %v318_v41 }
 0x1cb   : > { %v418_v53 = vpop.f32.mrb[0].mxu1 }
 0x1cc   : > { %v419_v54 = vadd.f32 %v418_v53, %v342_v50  ;;  %v420_v55 = vpop.f32.mrb[1].mxu1 }
 0x1cd   : > { %v421_v56 = vadd.f32 %v420_v55, %v346_v51 }
 0x1cf   : > { %v425_v58 = vcombine.low %v419_v54, %v421_v56 }
 0x1d1   : > { %v432_v59 = vrot.slane %v425_v58, %v431_v57 }
 0x1d3   : > { %v439_v60 = vrot.slane %v432_v59, %v431_v57 }
 0x1d5   : > { %445 = vst.msk [vmem:[%s236_s20] sm:$0x3] %vm443_vm2, %v439_v60 }
 0x1d6 PF: > { %s15_s18 = sadd.s32 1, %s595_s18  }
 0x1d7   : > { %p12_p4 = scmp.ge.s32.totalorder %s15_s18, 18  }
 0x1d9   :  { %14 = sbr.rel (!%p12_p4) target bundleno = 1 (0x1), region = 73 }

// kernel: hyper_conv_forward.3
= control target key start
LH: loop header
LB: loop body
LE: loop exit
PB: predicated region body
PF: predicated region fallthrough
CT: control target
= control target key end

     0   :  { %s1631_s15 = smov 0   ;;  %s1633_s16 = smov 0   ;;  %s2466_s0 = inlined_call_operand.vmem [shape: f32[2,24,18,16], index: 0, kind: input, shape index: {}, may-alias: {0,1}]   ;;  %s2467_s1 = inlined_call_operand.vmem [shape: f32[2,24,18,16], index: 1, kind: input, shape index: {}, may-alias: {0,1}]   ;;  %s2468_s2 = inlined_call_operand.vmem [shape: f32[144,128], index: 2, kind: input, shape index: {}]   ;;  %s2469_s3 = inlined_call_operand.vmem [shape: f32[1,128], index: 3, kind: input, shape index: {}]   ;;  %s2470_s4 = inlined_call_operand.vmem [shape: f32[2,16,16,128], index: 4, kind: output, shape index: {}]  }
   0x1   :  { %s1635_s17 = smov 0   ;;  %s1637_s18 = smov 0  }
   0x2   :  { %s1639_s19 = smov 0  }
   0x3 LB: > { %s29_s20 = sadd.s32 1, %s1588_s17  ;;  %s33_s21 = sadd.s32 1, %s1592_s18  ;;  %s1596_s19 = sphi %s1639_s19, %s14_s19   ;;  %s1592_s18 = sphi %s1637_s18, %s2474_s18   ;;  %s1588_s17 = sphi %s1635_s17, %s2473_s17   ;;  %s1584_s16 = sphi %s1633_s16, %s2472_s16   ;;  %s1580_s15 = sphi %s1631_s15, %s2471_s15  }
   0x4   : > { %p31_p0 = scmp.ge.s32.totalorder %s29_s20, 2  ;;  %p1432_p1 = scmp.ge.s32.totalorder %s1596_s19, 1 }
   0x5   : > { %p232_p2 = scmp.lt.s32.totalorder %s1596_s19, 5 }
   0x6   : > { %s2476_s20 = smov (%p31_p0, %s29_s20), 0  ;;  %s2478_s21 = smov (!%p31_p0, %s33_s21), %s1592_s18 }
   0x7   : > { %p233_p3 = pnand %p1432_p1, %p232_p2  ;;  %p35_p4 = scmp.ge.s32.totalorder %s2478_s21, 2 }
   0x8   : > { %s1661_s22 = sshll.u32 (!%p233_p3), %s1580_s15, 3  ;;  %p290_p5 = scmp.lt.s32.totalorder (!%p233_p3), %s1584_s16, 1  ;;  %v1032_v0 = vld [vmem:[%s2468_s2] sm:$0xff] (!%p233_p3)  ;;  %v1033_v1 = vld [vmem:[%s2468_s2 + $0x8] sm:$0xff] (!%p233_p3)  ;;  %v1598_v3 = vmov (!%p233_p3), 0.0|0.0   ;;  %vm364_vm0 = vcmask (!%p233_p3), 130048  }
   0x9   : > { %s2480_s21 = smov (%p35_p4, %s2478_s21), 0  ;;  %236 = sbr.rel (%p233_p3) target bundleno = 584 (0x248), region = 36 }
   0xa   : > { %p292_p6 = scmp.lt.s32.totalorder (!%p233_p3), %s1661_s22, 23  ;;  %v1463_v2 = vpack.c.bf16 (!%p233_p3), %v1033_v1, %v1032_v0  ;;  %1462 = vmatprep.subr.bf16.mxu0 (!%p233_p3), %v1598_v3  ;;  %1489 = vmatprep.subr.bf16.mxu1 (!%p233_p3), %v1598_v3  ;;  %v1034_v4 = vld [vmem:[%s2468_s2 + $0x10] sm:$0xff] (!%p233_p3)  ;;  %v1035_v5 = vld [vmem:[%s2468_s2 + $0x18] sm:$0xff] (!%p233_p3)  ;;  %vm511_vm1 = vcmask (!%p233_p3), 1045504   ;;  %vm405_vm2 = vcmask (!%p233_p3), 1046528   ;;  %s1599_s13 = smov (!%p233_p3), 48  }
   0xb   : > { %v1466_v6 = vpack.c.bf16 (!%p233_p3), %v1035_v5, %v1034_v4  ;;  %s1600_s14 = smov (!%p233_p3), 32   ;;  %s1601_s15 = smov (!%p233_p3), 16   ;;  %v1036_v61 = vld [vmem:[%s2468_s2 + $0x20] sm:$0xff] (!%p233_p3)  ;;  %v1037_v62 = vld [vmem:[%s2468_s2 + $0x28] sm:$0xff] (!%p233_p3)  ;;  %vm494_vm3 = vcmask (!%p233_p3), 261248   ;;  %vm600_vm4 = vcmask (!%p233_p3), 392448  }
   0xc   : > { %1464 = vmatpush1.bf16.msra.mxu0 (!%p233_p3), %v1463_v2  ;;  %1498 = vmatpush1.bf16.msra.mxu1 (!%p233_p3), %v1463_v2  ;;  %s1603_s11 = smov (!%p233_p3), 80   ;;  %s1604_s7 = smov (!%p233_p3), 96   ;;  %vm667_vm5 = vcmask (!%p233_p3), 523648   ;;  %vm738_vm6 = vcmask (!%p233_p3), 654848   ;;  %vm808_vm7 = vcmask (!%p233_p3), 786048   ;;  %vm875_vm8 = vcmask (!%p233_p3), 917248  }
   0xd   : > { %1465 = vmatprep.subr.bf16.mxu0 (!%p233_p3), %v1598_v3  ;;  %1490 = vmatprep.subr.bf16.mxu1 (!%p233_p3), %v1598_v3  ;;  %vm946_vm9 = vcmask (!%p233_p3), 1048448   ;;  %p323_p8 = scmp.lt.s32.totalorder (!%p233_p3), %s1661_s22, 15 }
  0x10   : > { %s2482_s16 = smov (!%p290_p5, %s1584_s16), 1  ;;  %1467 = vmatpush1.bf16.msra.mxu0 %v1466_v6  ;;  %1499 = vmatpush1.bf16.msra.mxu1 %v1466_v6 }
  0x11   : > { %s293_s23 = scalar_select %p292_p6, %s1661_s22, 23  ;;  %1468 = vmatprep.subr.bf16.mxu0 %v1598_v3  ;;  %1491 = vmatprep.subr.bf16.mxu1 %v1598_v3 }
  0x12   : > { %s1508_s24 = smul.u32 72, %s2482_s16 }
  0x13   : > { %s1507_s29 = smul.u32 3, %s293_s23  ;;  %s1602_s23 = smov 64  }
  0x15   : > { %s296_s30 = sadd.s32 %s1508_s24, %s1507_s29 }
  0x16   : > { %s1434_s5 = sshll.u32 %s296_s30, 3  ;;  %s1605_s30 = smov 112  }
  0x17   : > { %s1689_s12 = scalar_lea.vmem %s2466_s0, %s1434_s5 }
  0x18   : > { %v1692_v7 = vld [vmem:[%s1689_s12 + $0x78] sm:$0xff]  ;;  %v334_v9 = vld [vmem:[%s1689_s12] sm:$0xff]  ;;  %v1703_v10 = vld [vmem:[%s1689_s12 + $0x8] sm:$0xff] }
  0x19   : > { %v1695_v8 = vld [vmem:[%s1689_s12 + $0x18] sm:$0xff]  ;;  %635 = vrot.lane.b32.xlu1 %v1692_v7, %s1599_s13  ;;  %v512_v11 = vrot.slane %v334_v9, 2  ;;  %v406_v12 = vrot.slane %v334_v9, 1  ;;  %v1706_v13 = vld [vmem:[%s1689_s12 + $0x60] sm:$0xff]  ;;  %365 = vst.msk [vmem:[#allocation2] sm:$0xff] %vm364_vm0, %v334_v9  ;;  %375 = vst.msk [vmem:[#allocation2 + $0xa0] sm:$0xff] %vm364_vm0, %v1692_v7 }
  0x1a   : > { %619 = vrot.lane.b32.xlu0 %v1695_v8, %s1599_s13  ;;  %367 = vst.msk [vmem:[#allocation2 + $0x20] sm:$0xff] %vm364_vm0, %v1695_v8  ;;  %v513_v14 = vrot.slane %v1703_v10, 2  ;;  %v407_v15 = vrot.slane %v1703_v10, 1  ;;  %v1716_v16 = vld [vmem:[%s1689_s12 + $0x68] sm:$0xff]  ;;  %v532_v17 = vrot.slane %v1706_v13, 2  ;;  %366 = vst.msk [vmem:[#allocation2 + $0x10] sm:$0xff] %vm364_vm0, %v1703_v10 }
  0x1b   : > { %373 = vst.msk [vmem:[#allocation2 + $0x80] sm:$0xff] %vm364_vm0, %v1706_v13  ;;  %v426_v18 = vrot.slane %v1706_v13, 1  ;;  %v1725_v19 = vld [vmem:[%s1689_s12 + $0x80] sm:$0xff]  ;;  %v533_v20 = vrot.slane %v1716_v16, 2  ;;  %374 = vst.msk [vmem:[#allocation2 + $0x90] sm:$0xff] %vm364_vm0, %v1716_v16  ;;  %v427_v21 = vrot.slane %v1716_v16, 1 }
  0x1c   : > { %376 = vst.msk [vmem:[#allocation2 + $0xb0] sm:$0xff] %vm364_vm0, %v1725_v19  ;;  %v1734_v22 = vld [vmem:[%s1689_s12 + $0x20] sm:$0xff]  ;;  %v514_v23 = vsel %vm511_vm1, %v512_v11, %v513_v14  ;;  %v408_v24 = vsel %vm405_vm2, %v406_v12, %v407_v15  ;;  %v348_v25 = vld [vmem:[%s1689_s12 + $0x70] sm:$0x3]  ;;  %v431_v29 = vrot.slane %v1692_v7, 1  ;;  %v432_v30 = vrot.slane %v1725_v19, 1 }
  0x1d   : > { %368 = vst.msk [vmem:[#allocation2 + $0x30] sm:$0xff] %vm364_vm0, %v1734_v22  ;;  %v1748_v26 = vld [vmem:[%s1689_s12 + $0x90] sm:$0xff]  ;;  %552 = vrot.lane.b32.xlu1 %v514_v23, %s1600_s14  ;;  %v1756_v28 = vsel %vm511_vm1, %v532_v17, %v533_v20  ;;  %v411_v31 = vrot.slane %v1695_v8, 1  ;;  %v1766_v32 = vld [vmem:[%s1689_s12 + $0x98] sm:$0xff]  ;;  %v1774_v34 = vsel %vm405_vm2, %v426_v18, %v427_v21  ;;  %v412_v35 = vrot.slane %v1734_v22, 1  ;;  %v1787_v40 = vld [vmem:[%s1689_s12 + $0xa8] sm:$0xff] }
  0x1e   : > { %v1751_v27 = vld [vmem:[%s1689_s12 + $0x30] sm:$0xff]  ;;  %446 = vrot.lane.b32.xlu0 %v408_v24, %s1601_s15  ;;  %377 = vst.msk [vmem:[#allocation2 + $0xc0] sm:$0xff] %vm364_vm0, %v1748_v26  ;;  %v1769_v33 = vld [vmem:[%s1689_s12 + $0x38] sm:$0xff]  ;;  %988 = vst.msk [vmem:[#allocation2 + $0x48] sm:$0xff] %vm364_vm0, %v1756_v28  ;;  %v537_v37 = vrot.slane %v1692_v7, 2  ;;  %v538_v38 = vrot.slane %v1725_v19, 2  ;;  %v1818_v48 = vsel %vm405_vm2, %v431_v29, %v432_v30 }
  0x1f   : > { %369 = vst.msk [vmem:[#allocation2 + $0x40] sm:$0xff] %vm364_vm0, %v1751_v27  ;;  %v1778_v36 = vld [vmem:[%s1689_s12 + $0x10] sm:$0x3]  ;;  %378 = vst.msk [vmem:[#allocation2 + $0xd0] sm:$0xff] %vm364_vm0, %v1766_v32  ;;  %v535_v39 = vrot.slane %v348_v25, 2  ;;  %v1795_v42 = vld [vmem:[%s1689_s12 + $0x48] sm:$0xff]  ;;  %v1823_v49 = vsel %vm405_vm2, %v411_v31, %v412_v35 }
  0x20   : > { %370 = vst.msk [vmem:[#allocation2 + $0x50] sm:$0xff] %vm364_vm0, %v1769_v33  ;;  %v1790_v41 = vsel %vm511_vm1, %v537_v37, %v538_v38  ;;  %379 = vst.msk [vmem:[#allocation2 + $0xe0] sm:$0xff] %vm364_vm0, %v1787_v40  ;;  %v429_v43 = vrot.slane %v348_v25, 1  ;;  %v409_v44 = vrot.slane %v1778_v36, 1  ;;  %v1810_v46 = vld [vmem:[%s1689_s12 + $0xb0] sm:$0xff]  ;;  %v542_v52 = vrot.slane %v1748_v26, 2 }
  0x21   : > { %568 = vrot.lane.b32.xlu1 %v1756_v28, %s1600_s14  ;;  %990 = vst.msk [vmem:[#allocation2 + $0x68] sm:$0xff] %vm364_vm0, %v1790_v41  ;;  %v1805_v45 = vsel %vm511_vm1, %v533_v20, %v535_v39  ;;  %371 = vst.msk [vmem:[#allocation2 + $0x60] sm:$0xff] %vm364_vm0, %v1795_v42  ;;  %v1813_v47 = vld [vmem:[%s1689_s12 + $0x50] sm:$0xff]  ;;  %v1828_v50 = vld [vmem:[%s1689_s12 + $0x88] sm:$0x3]  ;;  %v543_v56 = vrot.slane %v1766_v32, 2 }
  0x22   : > { %462 = vrot.lane.b32.xlu0 %v1774_v34, %s1601_s15  ;;  %989 = vst.msk [vmem:[#allocation2 + $0x58] sm:$0xff] %vm364_vm0, %v1805_v45  ;;  %380 = vst.msk [vmem:[#allocation2 + $0xf0] sm:$0xff] %vm364_vm0, %v1810_v46  ;;  %v540_v51 = vrot.slane %v1828_v50, 2  ;;  %v1841_v53 = vsel %vm405_vm2, %v427_v21, %v429_v43  ;;  %v410_v54 = vsel %vm405_vm2, %v407_v15, %v409_v44  ;;  %v517_v57 = vrot.slane %v1695_v8, 2  ;;  %v1863_v63 = vld [vmem:[%s1689_s12 + $0xa0] sm:$0x3] }
  0x23   : > { %372 = vst.msk [vmem:[#allocation2 + $0x70] sm:$0xff] %vm364_vm0, %v1813_v47  ;;  %v518_v58 = vrot.slane %v1734_v22, 2  ;;  %v522_v59 = vrot.slane %v1751_v27, 2  ;;  %v523_v60 = vrot.slane %v1769_v33, 2  ;;  %v1866_v0 = vld [vmem:[%s1689_s12 + $0x40] sm:$0x3]  ;;  %v1869_v1 = vsel %vm511_vm1, %v542_v52, %v543_v56 }
  0x24   : > { %v1847_v55 = vsel %vm511_vm1, %v538_v38, %v540_v51  ;;  %992 = vst.msk [vmem:[#allocation2 + $0x88] sm:$0xff] %vm364_vm0, %v1869_v1  ;;  %v545_v4 = vrot.slane %v1863_v63, 2  ;;  %v525_v5 = vrot.slane %v1866_v0, 2  ;;  %v515_v6 = vrot.slane %v1778_v36, 2  ;;  %v1038_v9 = vld [vmem:[%s2468_s2 + $0x30] sm:$0xff]  ;;  %v1039_v11 = vld [vmem:[%s2468_s2 + $0x38] sm:$0xff] }
  0x25   : > { %706 = vrot.lane.b32.xlu1 %v1818_v48, %s1602_s23  ;;  %991 = vst.msk [vmem:[#allocation2 + $0x78] sm:$0xff] %vm364_vm0, %v1847_v55  ;;  %v1874_v2 = vsel %vm511_vm1, %v522_v59, %v523_v60  ;;  %v1469_v8 = vpack.c.bf16 %v1037_v62, %v1036_v61  ;;  %v1893_v12 = vsel %vm511_vm1, %v517_v57, %v518_v58  ;;  %v547_v18 = vrot.slane %v1787_v40, 2  ;;  %v1040_v25 = vld [vmem:[%s2468_s2 + $0x40] sm:$0xff]  ;;  %v1041_v29 = vld [vmem:[%s2468_s2 + $0x48] sm:$0xff]  ;;  %v1042_v10 = vld [vmem:[%s2468_s2 + $0x50] sm:$0xff] }
  0x26   : > { %690 = vrot.lane.b32.xlu0 %v1823_v49, %s1602_s23  ;;  %984 = vst.msk [vmem:[#allocation2 + $0x8] sm:$0xff] %vm364_vm0, %v1874_v2  ;;  %v1896_v15 = vsel %vm511_vm1, %v543_v56, %v545_v4  ;;  %v1899_v17 = vsel %vm511_vm1, %v523_v60, %v525_v5  ;;  %v548_v20 = vrot.slane %v1810_v46, 2  ;;  %v527_v21 = vrot.slane %v1795_v42, 2  ;;  %v1946_v43 = vld [vmem:[%s1689_s12 + $0xb8] sm:$0x3]  ;;  %v1044_v44 = vld [vmem:[%s2468_s2 + $0x60] sm:$0xff] }
  0x27   : > { %993 = vst.msk [vmem:[#allocation2 + $0x98] sm:$0xff] %vm364_vm0, %v1896_v15  ;;  %985 = vst.msk [vmem:[#allocation2 + $0x18] sm:$0xff] %vm364_vm0, %v1899_v17  ;;  %1470 = vmatpush1.bf16.msra.mxu0 %v1469_v8  ;;  %1500 = vmatpush1.bf16.msra.mxu1 %v1469_v8  ;;  %v528_v23 = vrot.slane %v1813_v47, 2  ;;  %v1472_v24 = vpack.c.bf16 %v1039_v11, %v1038_v9  ;;  %v516_v37 = vsel %vm511_vm1, %v513_v14, %v515_v6  ;;  %v1043_v14 = vld [vmem:[%s2468_s2 + $0x58] sm:$0xff]  ;;  %v1045_v51 = vld [vmem:[%s2468_s2 + $0x68] sm:$0xff] }
  0x28   : > { %1471 = vmatprep.subr.bf16.mxu0 %v1598_v3  ;;  %1492 = vmatprep.subr.bf16.mxu1 %v1598_v3  ;;  %v1922_v31 = vsel %vm511_vm1, %v547_v18, %v548_v20  ;;  %v1475_v38 = vpack.c.bf16 %v1041_v29, %v1040_v25  ;;  %v1478_v39 = vpack.c.bf16 %v1043_v14, %v1042_v10  ;;  %v436_v52 = vrot.slane %v1748_v26, 1  ;;  %v1963_v56 = vld [vmem:[%s1689_s12 + $0x58] sm:$0x3]  ;;  %v339_v5 = vld [vmem:[%s1689_s12 + $0x28] sm:$0x3]  ;;  %v1046_v8 = vld [vmem:[%s2468_s2 + $0x70] sm:$0xff] }
  0x29   : > { %464 = vrot.lane.b32.xlu1 %v1841_v53, %s1601_s15  ;;  %v1925_v36 = vsel %vm511_vm1, %v527_v21, %v528_v23  ;;  %994 = vst.msk [vmem:[#allocation2 + $0xa8] sm:$0xff] %vm364_vm0, %v1922_v31  ;;  %v416_v60 = vrot.slane %v1751_v27, 1  ;;  %v417_v61 = vrot.slane %v1769_v33, 1  ;;  %v550_v62 = vrot.slane %v1946_v43, 2  ;;  %v1047_v9 = vld [vmem:[%s2468_s2 + $0x78] sm:$0xff]  ;;  %s1461_s12 = sadd.s32 8, %s1661_s22 }
  0x2a   : > { %448 = vrot.lane.b32.xlu0 %v410_v54, %s1601_s15  ;;  %986 = vst.msk [vmem:[#allocation2 + $0x28] sm:$0xff] %vm364_vm0, %v1925_v36  ;;  %v437_v54 = vrot.slane %v1766_v32, 1  ;;  %v530_v4 = vrot.slane %v1963_v56, 2  ;;  %v1481_v6 = vpack.c.bf16 %v1045_v51, %v1044_v44  ;;  %v1484_v25 = vpack.c.bf16 %v1047_v9, %v1046_v8  ;;  %p304_p7 = scmp.lt.s32.totalorder %s1461_s12, 23  ;;  %v1048_v29 = vld [vmem:[%s2468_s2 + $0x80] sm:$0xff]  ;;  %s2486_s22 = smov (!%p323_p8, %s1661_s22), 15 }
  0x2b   : > { %1473 = vmatpush1.bf16.msra.mxu0 %v1472_v24  ;;  %1501 = vmatpush1.bf16.msra.mxu1 %v1472_v24  ;;  %v1017_v59 = vld [vmem:[#allocation2 + $0x88] sm:$0xff]  ;;  %v1981_v11 = vsel %vm511_vm1, %v548_v20, %v550_v62  ;;  %v2003_v21 = vsel %vm405_vm2, %v416_v60, %v417_v61  ;;  %v414_v24 = vrot.slane %v339_v5, 1  ;;  %v421_v60 = vrot.slane %v1795_v42, 1 }
  0x2c   : > { %1474 = vmatprep.subr.bf16.mxu0 %v1598_v3  ;;  %1493 = vmatprep.subr.bf16.mxu1 %v1598_v3  ;;  %v1984_v18 = vsel %vm511_vm1, %v528_v23, %v530_v4  ;;  %995 = vst.msk [vmem:[#allocation2 + $0xb8] sm:$0xff] %vm364_vm0, %v1981_v11  ;;  %v1998_v20 = vsel %vm405_vm2, %v436_v52, %v437_v54  ;;  %v434_v23 = vrot.slane %v1828_v50, 1  ;;  %s2484_s12 = smov (!%p304_p7, %s1461_s12), 23  ;;  %v424_v8 = vrot.slane %v1963_v56, 1 }
  0x2d   : > { %776 = vrot.lane.b32.xlu1 %v1790_v41, %s1603_s11  ;;  %v1001_v57 = vld [vmem:[#allocation2 + $0x8] sm:$0xff]  ;;  %1450 = vmatprep.mubr.msk.f32.mxu1 %vm364_vm0, %v1017_v59  ;;  %987 = vst.msk [vmem:[#allocation2 + $0x38] sm:$0xff] %vm364_vm0, %v1984_v18  ;;  %s1509_s5 = smul.u32 3, %s2484_s12  ;;  %v442_v59 = vrot.slane %v1810_v46, 1 }
  0x2e   : > { %760 = vrot.lane.b32.xlu0 %v1893_v12, %s1603_s11  ;;  %1442 = vmatprep.mubr.msk.f32.mxu0 %vm364_vm0, %v1001_v57  ;;  %v2021_v50 = vsel %vm405_vm2, %v432_v30, %v434_v23  ;;  %v520_v30 = vrot.slane %v339_v5, 2 }
  0x2f   : > { %1476 = vmatpush1.bf16.msra.mxu0 %v1475_v38  ;;  %1502 = vmatpush1.bf16.msra.mxu1 %v1475_v38  ;;  %v415_v38 = vsel %vm405_vm2, %v412_v35, %v414_v24  ;;  %s308_s6 = sadd.s32 %s1509_s5, %s1508_s24  ;;  %s1438_s24 = sshll.u32 %s2486_s22, 1 }
  0x30   : > { %1477 = vmatprep.subr.bf16.mxu0 %v1598_v3  ;;  %1494 = vmatprep.subr.bf16.mxu1 %v1598_v3  ;;  %v521_v35 = vsel %vm511_vm1, %v518_v58, %v520_v30  ;;  %s1436_s8 = sshll.u32 %s308_s6, 3 }
  0x31   : > { %570 = vrot.lane.b32.xlu1 %v1805_v45, %s1600_s14  ;;  %s2050_s25 = scalar_lea.vmem %s2467_s1, %s1436_s8 }
  0x32   : > { %554 = vrot.lane.b32.xlu0 %v516_v37, %s1600_s14  ;;  %v1049_v37 = vld [vmem:[%s2468_s2 + $0x88] sm:$0xff]  ;;  %v2114_v52 = vld [vmem:[%s2050_s25 + $0x10] sm:$0x3] }
  0x33   : > { %1479 = vmatpush1.bf16.msra.mxu0 %v1478_v39  ;;  %1503 = vmatpush1.bf16.msra.mxu1 %v1478_v39  ;;  %v1487_v10 = vpack.c.bf16 %v1049_v37, %v1048_v29  ;;  %v2141_v5 = vld [vmem:[%s2050_s25 + $0x28] sm:$0x3] }
  0x34   : > { %1480 = vmatprep.subr.bf16.mxu0 %v1598_v3  ;;  %1495 = vmatprep.subr.bf16.mxu1 %v1598_v3 }
  0x35   : > { %843 = vrot.lane.b32.xlu1 %v1748_v26, %s1604_s7 }
  0x36   : > { %827 = vrot.lane.b32.xlu0 %v1751_v27, %s1604_s7 }
  0x37   : > { %1482 = vmatpush1.bf16.msra.mxu0 %v1481_v6  ;;  %1504 = vmatpush1.bf16.msra.mxu1 %v1481_v6  ;;  %v966_v6 = vrot.slane %v2141_v5, 2 }
  0x38   : > { %1483 = vmatprep.subr.bf16.mxu0 %v1598_v3  ;;  %1496 = vmatprep.subr.bf16.mxu1 %v1598_v3 }
  0x39   : > { %637 = vrot.lane.b32.xlu1 %v1725_v19, %s1599_s13 }
  0x3a   : > { %621 = vrot.lane.b32.xlu0 %v1734_v22, %s1599_s13  ;;  %v2060_v22 = vld [vmem:[%s2050_s25 + $0x8] sm:$0xff] }
  0x3b   : > { %1485 = vmatpush1.bf16.msra.mxu0 %v1484_v25  ;;  %1505 = vmatpush1.bf16.msra.mxu1 %v1484_v25 }
  0x3c   : > { %1486 = vmatprep.subr.bf16.mxu0 %v1598_v3  ;;  %1497 = vmatprep.subr.bf16.mxu1 %v1598_v3  ;;  %v2057_v3 = vld [vmem:[%s2050_s25] sm:$0xff] }
  0x3d   : > { %914 = vrot.lane.b32.xlu1 %v1998_v20, %s1605_s30  ;;  %v755_v58 = vrot.slane %v2057_v3, 2  ;;  %v685_v30 = vrot.slane %v2057_v3, 1 }
  0x3e   : > { %898 = vrot.lane.b32.xlu0 %v2003_v21, %s1605_s30 }
  0x3f   : > { %1488 = vmatpush1.bf16.msra.mxu0 %v1487_v10  ;;  %1506 = vmatpush1.bf16.msra.mxu1 %v1487_v10 }
  0x41   : > { %708 = vrot.lane.b32.xlu1 %v2021_v50, %s1602_s23 }
  0x42   : > { %692 = vrot.lane.b32.xlu0 %v415_v38, %s1602_s23 }
  0x45   : > { %466 = vrot.lane.b32.xlu1 %v1818_v48, %s1601_s15 }
  0x46   : > { %450 = vrot.lane.b32.xlu0 %v1823_v49, %s1601_s15  ;;  %v419_v49 = vrot.slane %v1866_v0, 1 }
  0x48   : > { %v2083_v0 = vsel %vm405_vm2, %v417_v61, %v419_v49  ;;  %v422_v61 = vrot.slane %v1813_v47, 1 }
  0x49   : > { %778 = vrot.lane.b32.xlu1 %v1847_v55, %s1603_s11 }
  0x4a   : > { %762 = vrot.lane.b32.xlu0 %v521_v35, %s1603_s11  ;;  %v2138_v4 = vsel %vm405_vm2, %v421_v60, %v422_v61 }
  0x4d   : > { %572 = vrot.lane.b32.xlu1 %v1790_v41, %s1600_s14  ;;  %v439_v41 = vrot.slane %v1863_v63, 1 }
  0x4e   : > { %556 = vrot.lane.b32.xlu0 %v1893_v12, %s1600_s14  ;;  %v756_v12 = vrot.slane %v2060_v22, 2 }
  0x4f   : > { %v2078_v63 = vsel %vm405_vm2, %v437_v54, %v439_v41  ;;  %v758_v54 = vrot.slane %v2114_v52, 2 }
  0x50   : > { %v2067_v14 = vsel %vm511_vm1, %v755_v58, %v756_v12 }
  0x51   : > { %845 = vrot.lane.b32.xlu1 %v1766_v32, %s1604_s7  ;;  %996 = vst.msk [vmem:[#allocation2 + $0xc8] sm:$0xff] %vm364_vm0, %v2067_v14  ;;  %v2118_v57 = vsel %vm511_vm1, %v756_v12, %v758_v54 }
  0x52   : > { %829 = vrot.lane.b32.xlu0 %v1769_v33, %s1604_s7  ;;  %997 = vst.msk [vmem:[#allocation2 + $0xd8] sm:$0xff] %vm364_vm0, %v2118_v57 }
  0x55   : > { %639 = vrot.lane.b32.xlu1 %v1748_v26, %s1599_s13  ;;  %v2090_v26 = vld [vmem:[%s2050_s25 + $0x18] sm:$0xff] }
  0x56   : > { %623 = vrot.lane.b32.xlu0 %v1751_v27, %s1599_s13  ;;  %v2093_v27 = vld [vmem:[%s2050_s25 + $0x20] sm:$0xff]  ;;  %v963_v39 = vrot.slane %v2090_v26, 2 }
  0x57   : > { %v964_v44 = vrot.slane %v2093_v27, 2 }
  0x59   : > { %916 = vrot.lane.b32.xlu1 %v2078_v63, %s1605_s30  ;;  %v965_v51 = vsel %vm511_vm1, %v963_v39, %v964_v44 }
  0x5a   : > { %900 = vrot.lane.b32.xlu0 %v2083_v0, %s1605_s30  ;;  %998 = vst.msk [vmem:[#allocation2 + $0xe8] sm:$0xff] %vm364_vm0, %v965_v51 }
  0x5d   : > { %710 = vrot.lane.b32.xlu1 %v1998_v20, %s1602_s23 }
  0x5e   : > { %694 = vrot.lane.b32.xlu0 %v2003_v21, %s1602_s23 }
  0x61   : > { %468 = vrot.lane.b32.xlu1 %v2021_v50, %s1601_s15 }
  0x62   : > { %452 = vrot.lane.b32.xlu0 %v415_v38, %s1601_s15 }
  0x65   : > { %780 = vrot.lane.b32.xlu1 %v1869_v1, %s1603_s11 }
  0x66   : > { %764 = vrot.lane.b32.xlu0 %v1874_v2, %s1603_s11 }
  0x69   : > { %574 = vrot.lane.b32.xlu1 %v1847_v55, %s1600_s14  ;;  %v441_v55 = vrot.slane %v1787_v40, 1 }
  0x6a   : > { %558 = vrot.lane.b32.xlu0 %v521_v35, %s1600_s14 }
  0x6b   : > { %v2135_v62 = vsel %vm405_vm2, %v441_v55, %v442_v59  ;;  %v1003_v55 = vld [vmem:[#allocation2 + $0x18] sm:$0xff] }
  0x6d   : > { %847 = vrot.lane.b32.xlu1 %v1787_v40, %s1604_s7 }
  0x6e   : > { %831 = vrot.lane.b32.xlu0 %v1795_v42, %s1604_s7 }
  0x71   : > { %641 = vrot.lane.b32.xlu1 %v1766_v32, %s1599_s13  ;;  %v967_v32 = vsel %vm511_vm1, %v964_v44, %v966_v6 }
  0x72   : > { %625 = vrot.lane.b32.xlu0 %v1769_v33, %s1599_s13  ;;  %999 = vst.msk [vmem:[#allocation2 + $0xf8] sm:$0xff] %vm364_vm0, %v967_v32  ;;  %v444_v33 = vrot.slane %v1946_v43, 1 }
  0x75   : > { %918 = vrot.lane.b32.xlu1 %v2135_v62, %s1605_s30 }
  0x76   : > { %902 = vrot.lane.b32.xlu0 %v2138_v4, %s1605_s30 }
  0x79   : > { %712 = vrot.lane.b32.xlu1 %v2078_v63, %s1602_s23 }
  0x7a   : > { %696 = vrot.lane.b32.xlu0 %v2083_v0, %s1602_s23 }
  0x7d   : > { %470 = vrot.lane.b32.xlu1 %v1998_v20, %s1601_s15 }
  0x7e   : > { %454 = vrot.lane.b32.xlu0 %v2003_v21, %s1601_s15 }
  0x81   : > { %782 = vrot.lane.b32.xlu1 %v1896_v15, %s1603_s11 }
  0x82   : > { %766 = vrot.lane.b32.xlu0 %v1899_v17, %s1603_s11 }
  0x85   : > { %576 = vrot.lane.b32.xlu1 %v1869_v1, %s1600_s14  ;;  %v2177_v1 = vsel %vm405_vm2, %v442_v59, %v444_v33 }
  0x86   : > { %560 = vrot.lane.b32.xlu0 %v1874_v2, %s1600_s14  ;;  %v2180_v2 = vsel %vm405_vm2, %v422_v61, %v424_v8 }
  0x89   : > { %849 = vrot.lane.b32.xlu1 %v1810_v46, %s1604_s7 }
  0x8a   : > { %833 = vrot.lane.b32.xlu0 %v1813_v47, %s1604_s7 }
  0x8b   : > { %v636_v9 = vpop.permute.xlu1 %635 }
  0x8c   : > { %v620_v20 = vpop.permute.xlu0 %619 }
  0x8d   : > { %643 = vrot.lane.b32.xlu1 %v1787_v40, %s1599_s13 }
  0x8e   : > { %627 = vrot.lane.b32.xlu0 %v1795_v42, %s1599_s13 }
  0x8f   : > { %v553_v21 = vpop.permute.xlu1 %552 }
  0x90   : > { %v447_v43 = vpop.permute.xlu0 %446 }
  0x91   : > { %495 = vst.msk [vmem:[#allocation2] sm:$0xff] %vm494_vm3, %v447_v43  ;;  %920 = vrot.lane.b32.xlu1 %v2177_v1, %s1605_s30 }
  0x92   : > { %601 = vst.msk [vmem:[#allocation2] sm:$0xff] %vm600_vm4, %v553_v21  ;;  %904 = vrot.lane.b32.xlu0 %v2180_v2, %s1605_s30 }
  0x93   : > { %668 = vst.msk [vmem:[#allocation2] sm:$0xff] %vm667_vm5, %v620_v20  ;;  %v569_v40 = vpop.permute.xlu1 %568 }
  0x94   : > { %v463_v42 = vpop.permute.xlu0 %462 }
  0x95   : > { %503 = vst.msk [vmem:[#allocation2 + $0x80] sm:$0xff] %vm494_vm3, %v463_v42  ;;  %714 = vrot.lane.b32.xlu1 %v2135_v62, %s1602_s23  ;;  %v1005_v42 = vld [vmem:[#allocation2 + $0x28] sm:$0xff] }
  0x96   : > { %609 = vst.msk [vmem:[#allocation2 + $0x80] sm:$0xff] %vm600_vm4, %v569_v40  ;;  %698 = vrot.lane.b32.xlu0 %v2138_v4, %s1602_s23 }
  0x97   : > { %676 = vst.msk [vmem:[#allocation2 + $0x80] sm:$0xff] %vm667_vm5, %v636_v9  ;;  %v707_v56 = vpop.permute.xlu1 %706  ;;  %v1021_v9 = vld [vmem:[#allocation2 + $0xa8] sm:$0xff] }
  0x98   : > { %v691_v23 = vpop.permute.xlu0 %690  ;;  %747 = vst.msk [vmem:[#allocation2 + $0x80] sm:$0xff] %vm738_vm6, %v707_v56  ;;  %v894_v56 = vrot.slane %v2093_v27, 1 }
  0x99   : > { %739 = vst.msk [vmem:[#allocation2] sm:$0xff] %vm738_vm6, %v691_v23  ;;  %472 = vrot.lane.b32.xlu1 %v2078_v63, %s1601_s15 }
  0x9a   : > { %456 = vrot.lane.b32.xlu0 %v2083_v0, %s1601_s15  ;;  %v1019_v0 = vld [vmem:[#allocation2 + $0x98] sm:$0xff] }
  0x9b   : > { %v465_v24 = vpop.permute.xlu1 %464 }
  0x9c   : > { %v449_v25 = vpop.permute.xlu0 %448  ;;  %504 = vst.msk [vmem:[#allocation2 + $0x90] sm:$0xff] %vm494_vm3, %v465_v24 }
  0x9d   : > { %496 = vst.msk [vmem:[#allocation2 + $0x10] sm:$0xff] %vm494_vm3, %v449_v25  ;;  %784 = vrot.lane.b32.xlu1 %v1922_v31, %s1603_s11 }
  0x9e   : > { %768 = vrot.lane.b32.xlu0 %v1925_v36, %s1603_s11 }
  0x9f   : > { %v777_v29 = vpop.permute.xlu1 %776 }
  0xa0   : > { %v761_v37 = vpop.permute.xlu0 %760  ;;  %817 = vst.msk [vmem:[#allocation2 + $0x80] sm:$0xff] %vm808_vm7, %v777_v29  ;;  %v1023_v29 = vld [vmem:[#allocation2 + $0xb8] sm:$0xff] }
  0xa1   : > { %809 = vst.msk [vmem:[#allocation2] sm:$0xff] %vm808_vm7, %v761_v37  ;;  %578 = vrot.lane.b32.xlu1 %v1896_v15, %s1600_s14  ;;  %v686_v15 = vrot.slane %v2060_v22, 1 }
  0xa2   : > { %562 = vrot.lane.b32.xlu0 %v1899_v17, %s1600_s14 }
  0xa3   : > { %v571_v38 = vpop.permute.xlu1 %570  ;;  %v2229_v17 = vsel %vm405_vm2, %v685_v30, %v686_v15 }
  0xa4   : > { %v555_v10 = vpop.permute.xlu0 %554  ;;  %610 = vst.msk [vmem:[#allocation2 + $0x90] sm:$0xff] %vm600_vm4, %v571_v38 }
  0xa5   : > { %602 = vst.msk [vmem:[#allocation2 + $0x10] sm:$0xff] %vm600_vm4, %v555_v10  ;;  %851 = vrot.lane.b32.xlu1 %v2057_v3, %s1604_s7 }
  0xa6   : > { %835 = vrot.lane.b32.xlu0 %v1706_v13, %s1604_s7 }
  0xa7   : > { %v844_v35 = vpop.permute.xlu1 %843 }
  0xa8   : > { %v828_v41 = vpop.permute.xlu0 %827  ;;  %884 = vst.msk [vmem:[#allocation2 + $0x80] sm:$0xff] %vm875_vm8, %v844_v35 }
  0xa9   : > { %876 = vst.msk [vmem:[#allocation2] sm:$0xff] %vm875_vm8, %v828_v41  ;;  %645 = vrot.lane.b32.xlu1 %v1810_v46, %s1599_s13 }
  0xaa   : > { %629 = vrot.lane.b32.xlu0 %v1813_v47, %s1599_s13 }
  0xab   : > { %v638_v49 = vpop.permute.xlu1 %637 }
  0xac   : > { %v622_v58 = vpop.permute.xlu0 %621  ;;  %677 = vst.msk [vmem:[#allocation2 + $0x90] sm:$0xff] %vm667_vm5, %v638_v49 }
  0xad   : > { %669 = vst.msk [vmem:[#allocation2 + $0x10] sm:$0xff] %vm667_vm5, %v622_v58  ;;  %922 = vrot.lane.b32.xlu1 %v2229_v17, %s1605_s30 }
  0xae   : > { %906 = vrot.lane.b32.xlu0 %v1774_v34, %s1605_s30 }
  0xaf   : > { %v915_v46 = vpop.permute.xlu1 %914 }
  0xb0   : > { %v899_v12 = vpop.permute.xlu0 %898  ;;  %955 = vst.msk [vmem:[#allocation2 + $0x80] sm:$0xff] %vm946_vm9, %v915_v46 }
  0xb1   : > { %947 = vst.msk [vmem:[#allocation2] sm:$0xff] %vm946_vm9, %v899_v12  ;;  %716 = vrot.lane.b32.xlu1 %v2177_v1, %s1602_s23  ;;  %v1025_v12 = vld [vmem:[#allocation2 + $0xc8] sm:$0xff] }
  0xb2   : > { %700 = vrot.lane.b32.xlu0 %v2180_v2, %s1602_s23 }
  0xb3   : > { %v709_v47 = vpop.permute.xlu1 %708 }
  0xb4   : > { %v693_v63 = vpop.permute.xlu0 %692  ;;  %748 = vst.msk [vmem:[#allocation2 + $0x90] sm:$0xff] %vm738_vm6, %v709_v47  ;;  %v1009_v47 = vld [vmem:[#allocation2 + $0x48] sm:$0xff] }
  0xb5   : > { %740 = vst.msk [vmem:[#allocation2 + $0x10] sm:$0xff] %vm738_vm6, %v693_v63  ;;  %474 = vrot.lane.b32.xlu1 %v2135_v62, %s1601_s15 }
  0xb6   : > { %458 = vrot.lane.b32.xlu0 %v2138_v4, %s1601_s15  ;;  %v688_v4 = vrot.slane %v2114_v52, 1 }
  0xb7   : > { %v467_v39 = vpop.permute.xlu1 %466  ;;  %v1016_v54 = vld [vmem:[#allocation2 + $0x80] sm:$0xff] }
  0xb8   : > { %v451_v44 = vpop.permute.xlu0 %450  ;;  %v1000_v51 = vld [vmem:[#allocation2] sm:$0xff]  ;;  %505 = vst.msk [vmem:[#allocation2 + $0xa0] sm:$0xff] %vm494_vm3, %v467_v39  ;;  %1210 = vmatmul.mubr.f32.vlgmr.msra.gmra.mrb[0].mxu1 %v1016_v54 }
  0xb9   : > { %497 = vst.msk [vmem:[#allocation2 + $0x20] sm:$0xff] %vm494_vm3, %v451_v44  ;;  %1170 = vmatmul.mubr.f32.vlgmr.msra.gmra.mrb[0].mxu0 %v1000_v51  ;;  %786 = vrot.lane.b32.xlu1 %v1981_v11, %s1603_s11 }
  0xba   : > { %770 = vrot.lane.b32.xlu0 %v1984_v18, %s1603_s11  ;;  %1451 = vmatprep.mubr.msk.f32.mxu1 %vm364_vm0, %v1019_v0 }
  0xbb   : > { %1443 = vmatprep.mubr.msk.f32.mxu0 %vm364_vm0, %v1003_v55  ;;  %v779_v59 = vpop.permute.xlu1 %778 }
  0xbc   : > { %v763_v60 = vpop.permute.xlu0 %762  ;;  %818 = vst.msk [vmem:[#allocation2 + $0x90] sm:$0xff] %vm808_vm7, %v779_v59 }
  0xbd   : > { %810 = vst.msk [vmem:[#allocation2 + $0x10] sm:$0xff] %vm808_vm7, %v763_v60  ;;  %580 = vrot.lane.b32.xlu1 %v1922_v31, %s1600_s14  ;;  %v2277_v31 = vsel %vm405_vm2, %v686_v15, %v688_v4 }
  0xbe   : > { %564 = vrot.lane.b32.xlu0 %v1925_v36, %s1600_s14 }
  0xbf   : > { %v573_v61 = vpop.permute.xlu1 %572 }
  0xc0   : > { %v557_v62 = vpop.permute.xlu0 %556  ;;  %611 = vst.msk [vmem:[#allocation2 + $0xa0] sm:$0xff] %vm600_vm4, %v573_v61 }
  0xc1   : > { %603 = vst.msk [vmem:[#allocation2 + $0x20] sm:$0xff] %vm600_vm4, %v557_v62  ;;  %853 = vrot.lane.b32.xlu1 %v2060_v22, %s1604_s7 }
  0xc2   : > { %837 = vrot.lane.b32.xlu0 %v1716_v16, %s1604_s7 }
  0xc3   : > { %v846_v6 = vpop.permute.xlu1 %845 }
  0xc4   : > { %v830_v32 = vpop.permute.xlu0 %829  ;;  %885 = vst.msk [vmem:[#allocation2 + $0x90] sm:$0xff] %vm875_vm8, %v846_v6 }
  0xc5   : > { %877 = vst.msk [vmem:[#allocation2 + $0x10] sm:$0xff] %vm875_vm8, %v830_v32  ;;  %647 = vrot.lane.b32.xlu1 %v2057_v3, %s1599_s13 }
  0xc6   : > { %631 = vrot.lane.b32.xlu0 %v1706_v13, %s1599_s13 }
  0xc7   : > { %v640_v36 = vpop.permute.xlu1 %639 }
  0xc8   : > { %v624_v33 = vpop.permute.xlu0 %623  ;;  %678 = vst.msk [vmem:[#allocation2 + $0xa0] sm:$0xff] %vm667_vm5, %v640_v36 }
  0xc9   : > { %670 = vst.msk [vmem:[#allocation2 + $0x20] sm:$0xff] %vm667_vm5, %v624_v33  ;;  %924 = vrot.lane.b32.xlu1 %v2277_v31, %s1605_s30  ;;  %v1027_v33 = vld [vmem:[#allocation2 + $0xd8] sm:$0xff] }
  0xca   : > { %908 = vrot.lane.b32.xlu0 %v1841_v53, %s1605_s30 }
  0xcb   : > { %v917_v52 = vpop.permute.xlu1 %916 }
  0xcc   : > { %v901_v3 = vpop.permute.xlu0 %900  ;;  %956 = vst.msk [vmem:[#allocation2 + $0x90] sm:$0xff] %vm946_vm9, %v917_v52  ;;  %v1011_v52 = vld [vmem:[#allocation2 + $0x58] sm:$0xff] }
  0xcd   : > { %948 = vst.msk [vmem:[#allocation2 + $0x10] sm:$0xff] %vm946_vm9, %v901_v3  ;;  %718 = vrot.lane.b32.xlu1 %v2229_v17, %s1602_s23 }
  0xce   : > { %702 = vrot.lane.b32.xlu0 %v1774_v34, %s1602_s23 }
  0xcf   : > { %v711_v13 = vpop.permute.xlu1 %710 }
  0xd0   : > { %v695_v8 = vpop.permute.xlu0 %694  ;;  %749 = vst.msk [vmem:[#allocation2 + $0xa0] sm:$0xff] %vm738_vm6, %v711_v13 }
  0xd1   : > { %741 = vst.msk [vmem:[#allocation2 + $0x20] sm:$0xff] %vm738_vm6, %v695_v8  ;;  %476 = vrot.lane.b32.xlu1 %v2177_v1, %s1601_s15 }
  0xd2   : > { %460 = vrot.lane.b32.xlu0 %v2180_v2, %s1601_s15 }
  0xd3   : > { %v469_v20 = vpop.permute.xlu1 %468  ;;  %v1018_v40 = vld [vmem:[#allocation2 + $0x90] sm:$0xff] }
  0xd4   : > { %v453_v21 = vpop.permute.xlu0 %452  ;;  %v1002_v43 = vld [vmem:[#allocation2 + $0x10] sm:$0xff]  ;;  %506 = vst.msk [vmem:[#allocation2 + $0xb0] sm:$0xff] %vm494_vm3, %v469_v20  ;;  %1215 = vmatmul.mubr.f32.gmra.mrb[2].mxu1 %v1018_v40 }
  0xd5   : > { %498 = vst.msk [vmem:[#allocation2 + $0x30] sm:$0xff] %vm494_vm3, %v453_v21  ;;  %1175 = vmatmul.mubr.f32.gmra.mrb[2].mxu0 %v1002_v43  ;;  %788 = vrot.lane.b32.xlu1 %v2067_v14, %s1603_s11 }
  0xd6   : > { %772 = vrot.lane.b32.xlu0 %v1756_v28, %s1603_s11  ;;  %1452 = vmatprep.mubr.msk.f32.mxu1 %vm364_vm0, %v1021_v9  ;;  %v893_v28 = vrot.slane %v2090_v26, 1 }
  0xd7   : > { %1444 = vmatprep.mubr.msk.f32.mxu0 %vm364_vm0, %v1005_v42  ;;  %v781_v34 = vpop.permute.xlu1 %780 }
  0xd8   : > { %v765_v1 = vpop.permute.xlu0 %764  ;;  %819 = vst.msk [vmem:[#allocation2 + $0xa0] sm:$0xff] %vm808_vm7, %v781_v34 }
  0xd9   : > { %811 = vst.msk [vmem:[#allocation2 + $0x20] sm:$0xff] %vm808_vm7, %v765_v1  ;;  %582 = vrot.lane.b32.xlu1 %v1981_v11, %s1600_s14 }
  0xda   : > { %566 = vrot.lane.b32.xlu0 %v1984_v18, %s1600_s14  ;;  %v895_v18 = vsel %vm405_vm2, %v893_v28, %v894_v56 }
  0xdb   : > { %v575_v14 = vpop.permute.xlu1 %574 }
  0xdc   : > { %v559_v2 = vpop.permute.xlu0 %558  ;;  %612 = vst.msk [vmem:[#allocation2 + $0xb0] sm:$0xff] %vm600_vm4, %v575_v14 }
  0xdd   : > { %604 = vst.msk [vmem:[#allocation2 + $0x30] sm:$0xff] %vm600_vm4, %v559_v2  ;;  %855 = vrot.lane.b32.xlu1 %v2090_v26, %s1604_s7 }
  0xde   : > { %839 = vrot.lane.b32.xlu0 %v1692_v7, %s1604_s7 }
  0xdf   : > { %v848_v11 = vpop.permute.xlu1 %847 }
  0xe0   : > { %v832_v23 = vpop.permute.xlu0 %831  ;;  %886 = vst.msk [vmem:[#allocation2 + $0xa0] sm:$0xff] %vm875_vm8, %v848_v11 }
  0xe1   : > { %878 = vst.msk [vmem:[#allocation2 + $0x20] sm:$0xff] %vm875_vm8, %v832_v23  ;;  %649 = vrot.lane.b32.xlu1 %v2060_v22, %s1599_s13  ;;  %v1029_v23 = vld [vmem:[#allocation2 + $0xe8] sm:$0xff] }
  0xe2   : > { %633 = vrot.lane.b32.xlu0 %v1716_v16, %s1599_s13  ;;  %s1439_s13 = sshll.u32 %s2482_s16, 5 }
  0xe3   : > { %v642_v24 = vpop.permute.xlu1 %641  ;;  %s330_s14 = sadd.s32 %s1439_s13, %s1438_s24 }
  0xe4   : > { %v626_v7 = vpop.permute.xlu0 %625  ;;  %679 = vst.msk [vmem:[#allocation2 + $0xb0] sm:$0xff] %vm667_vm5, %v642_v24  ;;  %s1440_s15 = sshll.u32 %s330_s14, 3 }
  0xe5   : > { %671 = vst.msk [vmem:[#allocation2 + $0x30] sm:$0xff] %vm667_vm5, %v626_v7  ;;  %926 = vrot.lane.b32.xlu1 %v895_v18, %s1605_s30  ;;  %v1013_v18 = vld [vmem:[#allocation2 + $0x68] sm:$0xff]  ;;  %s2433_s26 = scalar_lea.vmem %s2470_s4, %s1440_s15 }
  0xe6   : > { %910 = vrot.lane.b32.xlu0 %v1818_v48, %s1605_s30  ;;  %v896_v48 = vrot.slane %v2141_v5, 1 }
  0xe7   : > { %v919_v26 = vpop.permute.xlu1 %918 }
  0xe8   : > { %v903_v25 = vpop.permute.xlu0 %902  ;;  %957 = vst.msk [vmem:[#allocation2 + $0xa0] sm:$0xff] %vm946_vm9, %v919_v26 }
  0xe9   : > { %949 = vst.msk [vmem:[#allocation2 + $0x20] sm:$0xff] %vm946_vm9, %v903_v25  ;;  %720 = vrot.lane.b32.xlu1 %v2277_v31, %s1602_s23 }
  0xea   : > { %704 = vrot.lane.b32.xlu0 %v1841_v53, %s1602_s23  ;;  %v1007_v53 = vld [vmem:[#allocation2 + $0x38] sm:$0xff] }
  0xeb   : > { %v713_v16 = vpop.permute.xlu1 %712 }
  0xec   : > { %v697_v22 = vpop.permute.xlu0 %696  ;;  %750 = vst.msk [vmem:[#allocation2 + $0xb0] sm:$0xff] %vm738_vm6, %v713_v16 }
  0xed   : > { %742 = vst.msk [vmem:[#allocation2 + $0x30] sm:$0xff] %vm738_vm6, %v697_v22  ;;  %790 = vrot.lane.b32.xlu1 %v2118_v57, %s1603_s11 }
  0xee   : > { %774 = vrot.lane.b32.xlu0 %v1805_v45, %s1603_s11  ;;  %v897_v45 = vsel %vm405_vm2, %v894_v56, %v896_v48 }
  0xef   : > { %v471_v37 = vpop.permute.xlu1 %470  ;;  %v1020_v30 = vld [vmem:[#allocation2 + $0xa0] sm:$0xff] }
  0xf0   : > { %v455_v38 = vpop.permute.xlu0 %454  ;;  %v1004_v10 = vld [vmem:[#allocation2 + $0x20] sm:$0xff]  ;;  %507 = vst.msk [vmem:[#allocation2 + $0xc0] sm:$0xff] %vm494_vm3, %v471_v37  ;;  %1220 = vmatmul.mubr.f32.gmra.mrb[4].mxu1 %v1020_v30 }
  0xf1   : > { %499 = vst.msk [vmem:[#allocation2 + $0x40] sm:$0xff] %vm494_vm3, %v455_v38  ;;  %1180 = vmatmul.mubr.f32.gmra.mrb[4].mxu0 %v1004_v10  ;;  %857 = vrot.lane.b32.xlu1 %v2093_v27, %s1604_s7 }
  0xf2   : > { %841 = vrot.lane.b32.xlu0 %v1725_v19, %s1604_s7  ;;  %1453 = vmatprep.mubr.msk.f32.mxu1 %vm364_vm0, %v1023_v29 }
  0xf3   : > { %1445 = vmatprep.mubr.msk.f32.mxu0 %vm364_vm0, %v1007_v53  ;;  %v783_v57 = vpop.permute.xlu1 %782 }
  0xf4   : > { %v767_v5 = vpop.permute.xlu0 %766  ;;  %820 = vst.msk [vmem:[#allocation2 + $0xb0] sm:$0xff] %vm808_vm7, %v783_v57 }
  0xf5   : > { %812 = vst.msk [vmem:[#allocation2 + $0x30] sm:$0xff] %vm808_vm7, %v767_v5  ;;  %928 = vrot.lane.b32.xlu1 %v897_v45, %s1605_s30 }
  0xf6   : > { %912 = vrot.lane.b32.xlu0 %v2021_v50, %s1605_s30 }
  0xf7   : > { %v577_v27 = vpop.permute.xlu1 %576 }
  0xf8   : > { %v561_v15 = vpop.permute.xlu0 %560  ;;  %613 = vst.msk [vmem:[#allocation2 + $0xc0] sm:$0xff] %vm600_vm4, %v577_v27  ;;  %v1015_v27 = vld [vmem:[#allocation2 + $0x78] sm:$0xff] }
  0xf9   : > { %605 = vst.msk [vmem:[#allocation2 + $0x40] sm:$0xff] %vm600_vm4, %v561_v15  ;;  %v1031_v15 = vld [vmem:[#allocation2 + $0xf8] sm:$0xff] }
  0xfb   : > { %v850_v19 = vpop.permute.xlu1 %849 }
  0xfc   : > { %v834_v35 = vpop.permute.xlu0 %833  ;;  %887 = vst.msk [vmem:[#allocation2 + $0xb0] sm:$0xff] %vm875_vm8, %v850_v19 }
  0xfd   : > { %879 = vst.msk [vmem:[#allocation2 + $0x30] sm:$0xff] %vm875_vm8, %v834_v35 }
  0xff   : > { %v644_v41 = vpop.permute.xlu1 %643 }
 0x100   : > { %v628_v17 = vpop.permute.xlu0 %627  ;;  %680 = vst.msk [vmem:[#allocation2 + $0xc0] sm:$0xff] %vm667_vm5, %v644_v41 }
 0x101   : > { %672 = vst.msk [vmem:[#allocation2 + $0x40] sm:$0xff] %vm667_vm5, %v628_v17 }
 0x103   : > { %v921_v49 = vpop.permute.xlu1 %920 }
 0x104   : > { %v905_v50 = vpop.permute.xlu0 %904  ;;  %958 = vst.msk [vmem:[#allocation2 + $0xb0] sm:$0xff] %vm946_vm9, %v921_v49 }
 0x105   : > { %950 = vst.msk [vmem:[#allocation2 + $0x30] sm:$0xff] %vm946_vm9, %v905_v50 }
 0x107   : > { %v715_v58 = vpop.permute.xlu1 %714 }
 0x108   : > { %v699_v46 = vpop.permute.xlu0 %698  ;;  %751 = vst.msk [vmem:[#allocation2 + $0xc0] sm:$0xff] %vm738_vm6, %v715_v58 }
 0x109   : > { %743 = vst.msk [vmem:[#allocation2 + $0x40] sm:$0xff] %vm738_vm6, %v699_v46 }
 0x10b   : > { %v473_v63 = vpop.permute.xlu1 %472  ;;  %v1022_v44 = vld [vmem:[#allocation2 + $0xb0] sm:$0xff] }
 0x10c   : > { %v457_v0 = vpop.permute.xlu0 %456  ;;  %v1006_v39 = vld [vmem:[#allocation2 + $0x30] sm:$0xff]  ;;  %508 = vst.msk [vmem:[#allocation2 + $0xd0] sm:$0xff] %vm494_vm3, %v473_v63  ;;  %1225 = vmatmul.mubr.f32.gmra.mrb[6].mxu1 %v1022_v44  ;;  %v1441_v63 = vld [vmem:[%s2469_s3] ss:$0 sm:$0xff] }
 0x10d   : > { %500 = vst.msk [vmem:[#allocation2 + $0x50] sm:$0xff] %vm494_vm3, %v457_v0  ;;  %1185 = vmatmul.mubr.f32.gmra.mrb[6].mxu0 %v1006_v39  ;;  %1454 = vmatprep.mubr.msk.f32.mxu1 %vm364_vm0, %v1025_v12 }
 0x10e   : > { %1446 = vmatprep.mubr.msk.f32.mxu0 %vm364_vm0, %v1009_v47 }
 0x10f   : > { %v785_v51 = vpop.permute.xlu1 %784 }
 0x110   : > { %v769_v54 = vpop.permute.xlu0 %768  ;;  %821 = vst.msk [vmem:[#allocation2 + $0xc0] sm:$0xff] %vm808_vm7, %v785_v51 }
 0x111   : > { %813 = vst.msk [vmem:[#allocation2 + $0x40] sm:$0xff] %vm808_vm7, %v769_v54 }
 0x113   : > { %v579_v55 = vpop.permute.xlu1 %578 }
 0x114   : > { %v563_v59 = vpop.permute.xlu0 %562  ;;  %614 = vst.msk [vmem:[#allocation2 + $0xd0] sm:$0xff] %vm600_vm4, %v579_v55 }
 0x115   : > { %606 = vst.msk [vmem:[#allocation2 + $0x50] sm:$0xff] %vm600_vm4, %v563_v59 }
 0x117   : > { %v852_v60 = vpop.permute.xlu1 %851 }
 0x118   : > { %v836_v61 = vpop.permute.xlu0 %835  ;;  %888 = vst.msk [vmem:[#allocation2 + $0xc0] sm:$0xff] %vm875_vm8, %v852_v60 }
 0x119   : > { %880 = vst.msk [vmem:[#allocation2 + $0x40] sm:$0xff] %vm875_vm8, %v836_v61 }
 0x11b   : > { %v646_v62 = vpop.permute.xlu1 %645 }
 0x11c   : > { %v630_v4 = vpop.permute.xlu0 %629  ;;  %681 = vst.msk [vmem:[#allocation2 + $0xd0] sm:$0xff] %vm667_vm5, %v646_v62 }
 0x11d   : > { %673 = vst.msk [vmem:[#allocation2 + $0x50] sm:$0xff] %vm667_vm5, %v630_v4 }
 0x11f   : > { %v923_v6 = vpop.permute.xlu1 %922 }
 0x120   : > { %v907_v32 = vpop.permute.xlu0 %906  ;;  %959 = vst.msk [vmem:[#allocation2 + $0xc0] sm:$0xff] %vm946_vm9, %v923_v6 }
 0x121   : > { %951 = vst.msk [vmem:[#allocation2 + $0x40] sm:$0xff] %vm946_vm9, %v907_v32 }
 0x123   : > { %v717_v31 = vpop.permute.xlu1 %716 }
 0x124   : > { %v701_v36 = vpop.permute.xlu0 %700  ;;  %752 = vst.msk [vmem:[#allocation2 + $0xd0] sm:$0xff] %vm738_vm6, %v717_v31 }
 0x125   : > { %744 = vst.msk [vmem:[#allocation2 + $0x50] sm:$0xff] %vm738_vm6, %v701_v36 }
 0x127   : > { %v475_v3 = vpop.permute.xlu1 %474  ;;  %v1024_v9 = vld [vmem:[#allocation2 + $0xc0] sm:$0xff] }
 0x128   : > { %v459_v13 = vpop.permute.xlu0 %458  ;;  %v1008_v8 = vld [vmem:[#allocation2 + $0x40] sm:$0xff]  ;;  %509 = vst.msk [vmem:[#allocation2 + $0xe0] sm:$0xff] %vm494_vm3, %v475_v3  ;;  %1230 = vmatmul.mubr.f32.gmra.mrb[8].mxu1 %v1024_v9 }
 0x129   : > { %501 = vst.msk [vmem:[#allocation2 + $0x60] sm:$0xff] %vm494_vm3, %v459_v13  ;;  %1190 = vmatmul.mubr.f32.gmra.mrb[8].mxu0 %v1008_v8  ;;  %1455 = vmatprep.mubr.msk.f32.mxu1 %vm364_vm0, %v1027_v33 }
 0x12a   : > { %1447 = vmatprep.mubr.msk.f32.mxu0 %vm364_vm0, %v1011_v52 }
 0x12b   : > { %v787_v20 = vpop.permute.xlu1 %786 }
 0x12c   : > { %v771_v21 = vpop.permute.xlu0 %770  ;;  %822 = vst.msk [vmem:[#allocation2 + $0xd0] sm:$0xff] %vm808_vm7, %v787_v20 }
 0x12d   : > { %814 = vst.msk [vmem:[#allocation2 + $0x50] sm:$0xff] %vm808_vm7, %v771_v21 }
 0x12f   : > { %v581_v43 = vpop.permute.xlu1 %580 }
 0x130   : > { %v565_v40 = vpop.permute.xlu0 %564  ;;  %615 = vst.msk [vmem:[#allocation2 + $0xe0] sm:$0xff] %vm600_vm4, %v581_v43 }
 0x131   : > { %607 = vst.msk [vmem:[#allocation2 + $0x60] sm:$0xff] %vm600_vm4, %v565_v40 }
 0x133   : > { %v854_v42 = vpop.permute.xlu1 %853 }
 0x134   : > { %v838_v34 = vpop.permute.xlu0 %837  ;;  %889 = vst.msk [vmem:[#allocation2 + $0xd0] sm:$0xff] %vm875_vm8, %v854_v42 }
 0x135   : > { %881 = vst.msk [vmem:[#allocation2 + $0x50] sm:$0xff] %vm875_vm8, %v838_v34 }
 0x137   : > { %v648_v1 = vpop.permute.xlu1 %647 }
 0x138   : > { %v632_v14 = vpop.permute.xlu0 %631  ;;  %682 = vst.msk [vmem:[#allocation2 + $0xe0] sm:$0xff] %vm667_vm5, %v648_v1 }
 0x139   : > { %674 = vst.msk [vmem:[#allocation2 + $0x60] sm:$0xff] %vm667_vm5, %v632_v14 }
 0x13b   : > { %v925_v2 = vpop.permute.xlu1 %924 }
 0x13c   : > { %v909_v28 = vpop.permute.xlu0 %908  ;;  %960 = vst.msk [vmem:[#allocation2 + $0xd0] sm:$0xff] %vm946_vm9, %v925_v2 }
 0x13d   : > { %952 = vst.msk [vmem:[#allocation2 + $0x50] sm:$0xff] %vm946_vm9, %v909_v28 }
 0x13f   : > { %v719_v56 = vpop.permute.xlu1 %718 }
 0x140   : > { %v703_v11 = vpop.permute.xlu0 %702  ;;  %753 = vst.msk [vmem:[#allocation2 + $0xe0] sm:$0xff] %vm738_vm6, %v719_v56 }
 0x141   : > { %745 = vst.msk [vmem:[#allocation2 + $0x60] sm:$0xff] %vm738_vm6, %v703_v11 }
 0x143   : > { %v477_v24 = vpop.permute.xlu1 %476  ;;  %v1026_v25 = vld [vmem:[#allocation2 + $0xd0] sm:$0xff] }
 0x144   : > { %v461_v7 = vpop.permute.xlu0 %460  ;;  %v1010_v26 = vld [vmem:[#allocation2 + $0x50] sm:$0xff]  ;;  %510 = vst.msk [vmem:[#allocation2 + $0xf0] sm:$0xff] %vm494_vm3, %v477_v24  ;;  %1235 = vmatmul.mubr.f32.gmra.mrb[10].mxu1 %v1026_v25 }
 0x145   : > { %502 = vst.msk [vmem:[#allocation2 + $0x70] sm:$0xff] %vm494_vm3, %v461_v7  ;;  %1195 = vmatmul.mubr.f32.gmra.mrb[10].mxu0 %v1010_v26  ;;  %1456 = vmatprep.mubr.msk.f32.mxu1 %vm364_vm0, %v1029_v23 }
 0x146   : > { %1448 = vmatprep.mubr.msk.f32.mxu0 %vm364_vm0, %v1013_v18 }
 0x147   : > { %v789_v16 = vpop.permute.xlu1 %788 }
 0x148   : > { %v773_v22 = vpop.permute.xlu0 %772  ;;  %823 = vst.msk [vmem:[#allocation2 + $0xe0] sm:$0xff] %vm808_vm7, %v789_v16 }
 0x149   : > { %815 = vst.msk [vmem:[#allocation2 + $0x60] sm:$0xff] %vm808_vm7, %v773_v22 }
 0x14b   : > { %v583_v48 = vpop.permute.xlu1 %582 }
 0x14c   : > { %v567_v29 = vpop.permute.xlu0 %566  ;;  %616 = vst.msk [vmem:[#allocation2 + $0xf0] sm:$0xff] %vm600_vm4, %v583_v48 }
 0x14d   : > { %608 = vst.msk [vmem:[#allocation2 + $0x70] sm:$0xff] %vm600_vm4, %v567_v29 }
 0x14f   : > { %v856_v37 = vpop.permute.xlu1 %855 }
 0x150   : > { %v840_v38 = vpop.permute.xlu0 %839  ;;  %890 = vst.msk [vmem:[#allocation2 + $0xe0] sm:$0xff] %vm875_vm8, %v856_v37 }
 0x151   : > { %882 = vst.msk [vmem:[#allocation2 + $0x60] sm:$0xff] %vm875_vm8, %v840_v38 }
 0x153   : > { %v650_v10 = vpop.permute.xlu1 %649 }
 0x154   : > { %v634_v30 = vpop.permute.xlu0 %633  ;;  %683 = vst.msk [vmem:[#allocation2 + $0xf0] sm:$0xff] %vm667_vm5, %v650_v10 }
 0x155   : > { %675 = vst.msk [vmem:[#allocation2 + $0x70] sm:$0xff] %vm667_vm5, %v634_v30 }
 0x157   : > { %v927_v53 = vpop.permute.xlu1 %926 }
 0x158   : > { %v911_v45 = vpop.permute.xlu0 %910  ;;  %961 = vst.msk [vmem:[#allocation2 + $0xe0] sm:$0xff] %vm946_vm9, %v927_v53 }
 0x159   : > { %953 = vst.msk [vmem:[#allocation2 + $0x60] sm:$0xff] %vm946_vm9, %v911_v45 }
 0x15b   : > { %v721_v57 = vpop.permute.xlu1 %720 }
 0x15c   : > { %v705_v5 = vpop.permute.xlu0 %704  ;;  %754 = vst.msk [vmem:[#allocation2 + $0xf0] sm:$0xff] %vm738_vm6, %v721_v57 }
 0x15d   : > { %746 = vst.msk [vmem:[#allocation2 + $0x70] sm:$0xff] %vm738_vm6, %v705_v5 }
 0x15f   : > { %v791_v19 = vpop.permute.xlu1 %790  ;;  %v1028_v17 = vld [vmem:[#allocation2 + $0xe0] sm:$0xff] }
 0x160   : > { %v775_v35 = vpop.permute.xlu0 %774  ;;  %v1012_v41 = vld [vmem:[#allocation2 + $0x60] sm:$0xff]  ;;  %824 = vst.msk [vmem:[#allocation2 + $0xf0] sm:$0xff] %vm808_vm7, %v791_v19  ;;  %1240 = vmatmul.mubr.f32.gmra.mrb[12].mxu1 %v1028_v17 }
 0x161   : > { %816 = vst.msk [vmem:[#allocation2 + $0x70] sm:$0xff] %vm808_vm7, %v775_v35  ;;  %1200 = vmatmul.mubr.f32.gmra.mrb[12].mxu0 %v1012_v41  ;;  %1457 = vmatprep.mubr.msk.f32.mxu1 %vm364_vm0, %v1031_v15 }
 0x162   : > { %1449 = vmatprep.mubr.msk.f32.mxu0 %vm364_vm0, %v1015_v27 }
 0x163   : > { %v858_v49 = vpop.permute.xlu1 %857 }
 0x164   : > { %v842_v50 = vpop.permute.xlu0 %841  ;;  %891 = vst.msk [vmem:[#allocation2 + $0xf0] sm:$0xff] %vm875_vm8, %v858_v49 }
 0x165   : > { %883 = vst.msk [vmem:[#allocation2 + $0x70] sm:$0xff] %vm875_vm8, %v842_v50 }
 0x167   : > { %v929_v58 = vpop.permute.xlu1 %928 }
 0x168   : > { %v913_v46 = vpop.permute.xlu0 %912  ;;  %962 = vst.msk [vmem:[#allocation2 + $0xf0] sm:$0xff] %vm946_vm9, %v929_v58 }
 0x169   : > { %954 = vst.msk [vmem:[#allocation2 + $0x70] sm:$0xff] %vm946_vm9, %v913_v46 }
 0x16f   : > { %v1030_v47 = vld [vmem:[#allocation2 + $0xf0] sm:$0xff] }
 0x170   : > { %v1014_v12 = vld [vmem:[#allocation2 + $0x70] sm:$0xff]  ;;  %1245 = vmatmul.mubr.f32.gmra.mrb[14].mxu1 %v1030_v47 }
 0x171   : > { %1205 = vmatmul.mubr.f32.gmra.mrb[14].mxu0 %v1014_v12 }
 0x18b   : > { %v1211_v39 = vpop.f32.mrb[0].mxu1 }
 0x18c   : > { %v1171_v0 = vpop.f32.mrb[0].mxu0  ;;  %v1212_v51 = vadd.f32 %v1441_v63, %v1211_v39  ;;  %v1213_v55 = vpop.f32.mrb[1].mxu1 }
 0x18d   : > { %v1172_v44 = vadd.f32 %v1441_v63, %v1171_v0  ;;  %v1173_v54 = vpop.f32.mrb[1].mxu0 }
 0x18e   : > { %1258 = vst [vmem:[%s2433_s26 + $0x40] sm:$0xff] %v1212_v51 }
 0x18f   : > { %1250 = vst [vmem:[%s2433_s26] sm:$0xff] %v1172_v44 }
 0x1a7   : > { %v1216_v60 = vpop.f32.mrb[2].mxu1 }
 0x1a8   : > { %v1176_v59 = vpop.f32.mrb[2].mxu0  ;;  %v1217_v62 = vadd.f32 %v1441_v63, %v1216_v60  ;;  %v1218_v6 = vpop.f32.mrb[3].mxu1 }
 0x1a9   : > { %v1177_v61 = vadd.f32 %v1441_v63, %v1176_v59  ;;  %v1178_v4 = vpop.f32.mrb[3].mxu0 }
 0x1aa   : > { %1259 = vst [vmem:[%s2433_s26 + $0x48] sm:$0xff] %v1217_v62 }
 0x1ab   : > { %1251 = vst [vmem:[%s2433_s26 + $0x8] sm:$0xff] %v1177_v61 }
 0x1c3   : > { %v1221_v31 = vpop.f32.mrb[4].mxu1 }
 0x1c4   : > { %v1181_v32 = vpop.f32.mrb[4].mxu0  ;;  %v1222_v33 = vadd.f32 %v1441_v63, %v1221_v31  ;;  %v1223_v3 = vpop.f32.mrb[5].mxu1 }
 0x1c5   : > { %v1182_v36 = vadd.f32 %v1441_v63, %v1181_v32  ;;  %v1183_v52 = vpop.f32.mrb[5].mxu0 }
 0x1c6   : > { %1260 = vst [vmem:[%s2433_s26 + $0x50] sm:$0xff] %v1222_v33 }
 0x1c7   : > { %1252 = vst [vmem:[%s2433_s26 + $0x10] sm:$0xff] %v1182_v36 }
 0x1df   : > { %v1226_v8 = vpop.f32.mrb[6].mxu1 }
 0x1e0   : > { %v1186_v13 = vpop.f32.mrb[6].mxu0  ;;  %v1227_v20 = vadd.f32 %v1441_v63, %v1226_v8  ;;  %v1228_v43 = vpop.f32.mrb[7].mxu1 }
 0x1e1   : > { %v1187_v9 = vadd.f32 %v1441_v63, %v1186_v13  ;;  %v1188_v21 = vpop.f32.mrb[7].mxu0 }
 0x1e2   : > { %1261 = vst [vmem:[%s2433_s26 + $0x58] sm:$0xff] %v1227_v20 }
 0x1e3   : > { %1253 = vst [vmem:[%s2433_s26 + $0x18] sm:$0xff] %v1187_v9 }
 0x1fb   : > { %v1231_v42 = vpop.f32.mrb[8].mxu1 }
 0x1fc   : > { %v1191_v40 = vpop.f32.mrb[8].mxu0  ;;  %v1232_v1 = vadd.f32 %v1441_v63, %v1231_v42  ;;  %v1233_v2 = vpop.f32.mrb[9].mxu1 }
 0x1fd   : > { %v1192_v34 = vadd.f32 %v1441_v63, %v1191_v40  ;;  %v1193_v14 = vpop.f32.mrb[9].mxu0 }
 0x1fe   : > { %1262 = vst [vmem:[%s2433_s26 + $0x60] sm:$0xff] %v1232_v1 }
 0x1ff   : > { %1254 = vst [vmem:[%s2433_s26 + $0x20] sm:$0xff] %v1192_v34 }
 0x217   : > { %v1236_v56 = vpop.f32.mrb[10].mxu1 }
 0x218   : > { %v1196_v28 = vpop.f32.mrb[10].mxu0  ;;  %v1237_v23 = vadd.f32 %v1441_v63, %v1236_v56  ;;  %v1238_v24 = vpop.f32.mrb[11].mxu1 }
 0x219   : > { %v1197_v11 = vadd.f32 %v1441_v63, %v1196_v28  ;;  %v1198_v18 = vpop.f32.mrb[11].mxu0 }
 0x21a   : > { %1263 = vst [vmem:[%s2433_s26 + $0x68] sm:$0xff] %v1237_v23 }
 0x21b   : > { %1255 = vst [vmem:[%s2433_s26 + $0x28] sm:$0xff] %v1197_v11 }
 0x233   : > { %v1241_v26 = vpop.f32.mrb[12].mxu1 }
 0x234   : > { %v1201_v7 = vpop.f32.mrb[12].mxu0  ;;  %v1242_v16 = vadd.f32 %v1441_v63, %v1241_v26  ;;  %v1243_v48 = vpop.f32.mrb[13].mxu1 }
 0x235   : > { %v1202_v25 = vadd.f32 %v1441_v63, %v1201_v7  ;;  %v1203_v22 = vpop.f32.mrb[13].mxu0 }
 0x236   : > { %1264 = vst [vmem:[%s2433_s26 + $0x70] sm:$0xff] %v1242_v16 }
 0x237   : > { %1256 = vst [vmem:[%s2433_s26 + $0x30] sm:$0xff] %v1202_v25 }
 0x243   : > { %v1246_v37 = vpop.f32.mrb[14].mxu1 }
 0x244   : > { %v1206_v29 = vpop.f32.mrb[14].mxu0  ;;  %v1247_v10 = vadd.f32 %v1441_v63, %v1246_v37  ;;  %v1248_v53 = vpop.f32.mrb[15].mxu1 }
 0x245   : > { %v1207_v38 = vadd.f32 %v1441_v63, %v1206_v29  ;;  %v1208_v30 = vpop.f32.mrb[15].mxu0 }
 0x246   : > { %1265 = vst [vmem:[%s2433_s26 + $0x78] sm:$0xff] %v1247_v10 }
 0x247   : > { %1257 = vst [vmem:[%s2433_s26 + $0x38] sm:$0xff] %v1207_v38 }
 0x248 PF: > { %s14_s19 = sadd.s32 1, %s1596_s19   ;;  %s2471_s15 = smov %s1588_s17 }
 0x249   : > { %p11_p9 = scmp.ge.s32.totalorder %s14_s19, 6   ;;  %s2472_s16 = smov %s1592_s18 }
 0x24a   : > { %s2473_s17 = smov %s2476_s20  ;;  %s2474_s18 = smov %s2480_s21 }
 0x24b   :  { %13 = sbr.rel (!%p11_p9) target bundleno = 3 (0x3), region = 75 }

</bundles_post_ra>
